<compile_context>
chip_gen: v7x
topology: tpu7x:2x2x1
jax: 0.10.0
libtpu: 0.0.40
codegen_flags: <defaults>
</compile_context>

<pallas_src>
import jax
import jax.numpy as jnp
import numpy as np
from jax.experimental import pallas as pl
from jax.experimental.pallas import tpu as pltpu

HIDDEN = 50   # real hidden size
HP = 64       # padded hidden size (4*HP = 256 lanes = 2 clean lane tiles)
INPUT = 4     # input feature size
BP = 8        # padded batch (one full f32 sublane tile)

# Packed gate slot -> PyTorch gate index.  PyTorch order is [i, f, g, o];
# we pack as [i, f, o, g] so the three sigmoid gates are contiguous.
GATE_ORDER = (0, 1, 3, 2)


# ----------------------------------------------------------------------------
# Kernel
# ----------------------------------------------------------------------------
def _make_kernel(seq: int, Bp: int):
    Hp = HP

    def kernel(x_ref, w1x_ref, w1h_ref, b1_ref, w2a_ref, w2b_ref, b2_ref,
               wf_ref, bf_ref, o_ref):
        # ---- Hoisted layer-1 input projection: one lane-dense MXU call for
        #      all timesteps (includes the layer-1 bias). ----
        xp = jnp.dot(x_ref[...], w1x_ref[...],
                     preferred_element_type=jnp.float32) + b1_ref[...]

        w1h = w1h_ref[...]
        w2a = w2a_ref[...]
        w2b = w2b_ref[...]
        b2 = b2_ref[...]

        def gates(pre):
            # Packed order [i | f | o | g]: one sigmoid over the contiguous
            # 3*Hp sigmoid slab, one tanh over the g slab.
            s = jax.nn.sigmoid(pre[:, 0:3 * Hp])
            g = jnp.tanh(pre[:, 3 * Hp:4 * Hp])
            return s[:, 0:Hp], s[:, Hp:2 * Hp], s[:, 2 * Hp:3 * Hp], g

        # Value-carried recurrent state (h0 = c0 = 0, PyTorch default).
        zeros = jnp.zeros((Bp, Hp), jnp.float32)
        h1, c1, h2, c2 = zeros, zeros, zeros, zeros

        ys = []
        # seq is small & static: fully unroll so every slice is static and the
        # whole recurrence is one basic block (maximal scheduler visibility).
        for t in range(seq):
            # ----- LSTM layer 1 (x-part hoisted above) -----
            pre1 = xp[t * Bp:(t + 1) * Bp, :] + jnp.dot(
                h1, w1h, preferred_element_type=jnp.float32)
            i1, f1, o1, g1 = gates(pre1)
            c1 = f1 * c1 + i1 * g1
            h1 = o1 * jnp.tanh(c1)          # recurrence carries pre-ReLU h
            r1 = jnp.maximum(h1, 0.0)       # layer-2 input = relu(h1)

            # ----- LSTM layer 2: split weights, no concat buffer -----
            pre2 = (jnp.dot(r1, w2a, preferred_element_type=jnp.float32)
                    + jnp.dot(h2, w2b, preferred_element_type=jnp.float32)
                    + b2)
            i2, f2, o2, g2 = gates(pre2)
            c2 = f2 * c2 + i2 * g2
            h2 = o2 * jnp.tanh(c2)          # recurrence carries pre-ReLU h
            ys.append(jnp.maximum(h2, 0.0))

        # ---- Final Linear(50 -> 1): one matmul over all timesteps, one store.
        hs = jnp.concatenate(ys, axis=0)    # (seq*Bp, Hp)
        y = jnp.dot(hs, wf_ref[...],
                    preferred_element_type=jnp.float32) + bf_ref[...]
        o_ref[...] = y.astype(o_ref.dtype)

    return kernel


def model3_forward(x, kparams):
    """x: (seq, batch, 4) float32 -> (seq, batch, 1) float32."""
    seq, B, I = x.shape
    assert I == INPUT
    (w1x, w1h, b1, w2a, w2b, b2, wf, bf) = kparams

    # Pad batch to a full f32 sublane tile; pad rows are independent of the
    # real rows and get sliced off below.
    Bp = max(BP, ((B + 7) // 8) * 8)
    if Bp != B:
        x = jnp.pad(x, ((0, 0), (0, Bp - B), (0, 0)))
    x2d = x.reshape(seq * Bp, I)            # row t*Bp + b == x[t, b, :]

    full2d = lambda a: pl.BlockSpec(a.shape, lambda i: (0, 0))

    out = pl.pallas_call(
        _make_kernel(seq, Bp),
        out_shape=jax.ShapeDtypeStruct((seq * Bp, 1), jnp.float32),
        grid_spec=pltpu.PrefetchScalarGridSpec(
            num_scalar_prefetch=0,
            grid=(1,),
            in_specs=[full2d(a)
                      for a in (x2d, w1x, w1h, b1, w2a, w2b, b2, wf, bf)],
            out_specs=pl.BlockSpec((seq * Bp, 1), lambda i: (0, 0)),
        ),
        compiler_params=pltpu.CompilerParams(
            dimension_semantics=("arbitrary",),
        ),
    )(x2d, w1x, w1h, b1, w2a, w2b, b2, wf, bf)

    return out.reshape(seq, Bp, 1)[:, :B, :]


# ----------------------------------------------------------------------------
# Deterministic parameter init (PyTorch-style U(-1/sqrt(H), 1/sqrt(H)))
# ----------------------------------------------------------------------------
def init_params(key):
    H, I = HIDDEN, INPUT
    bound = 1.0 / np.sqrt(H)
    ks = jax.random.split(key, 10)
    u = lambda k, shape: jax.random.uniform(k, shape, jnp.float32, -bound, bound)
    return {
        # lstm1
        "w_ih1": u(ks[0], (4 * H, I)), "w_hh1": u(ks[1], (4 * H, H)),
        "b_ih1": u(ks[2], (4 * H,)),   "b_hh1": u(ks[3], (4 * H,)),
        # lstm2
        "w_ih2": u(ks[4], (4 * H, H)), "w_hh2": u(ks[5], (4 * H, H)),
        "b_ih2": u(ks[6], (4 * H,)),   "b_hh2": u(ks[7], (4 * H,)),
        # fnc1
        "w_fc": u(ks[8], (1, H)),      "b_fc": u(ks[9], (1,)),
    }


def to_kernel_params(p):
    """Repack PyTorch-shaped params into fused, transposed, zero-padded operands.

    Per weight: a (K, 4*HP) matrix with gate columns in packed order [i|f|o|g],
    each HP wide (cols 50:64 zero).  Biases (b_ih + b_hh) become one (1, 4*HP)
    row.  Layer 2 keeps input-weights (W2a, applied to relu(h1)) and
    hidden-weights (W2b, applied to h2) as separate matrices — no concat buffer
    in the kernel.
    """
    H, Hp, I = HIDDEN, HP, INPUT

    def gate_pack(w, in_dim, in_pad):
        w = np.asarray(w, np.float32)                      # (4H, in_dim)
        out = np.zeros((in_pad, 4 * Hp), np.float32)
        for slot, src in enumerate(GATE_ORDER):
            out[:in_dim, slot * Hp:slot * Hp + H] = w[src * H:(src + 1) * H, :].T
        return out

    def bias_pack(bi, bh):
        b = np.asarray(bi, np.float32) + np.asarray(bh, np.float32)   # (4H,)
        out = np.zeros((1, 4 * Hp), np.float32)
        for slot, src in enumerate(GATE_ORDER):
            out[0, slot * Hp:slot * Hp + H] = b[src * H:(src + 1) * H]
        return out

    w1x = gate_pack(p["w_ih1"], I, I)       # (I, 4Hp)
    w1h = gate_pack(p["w_hh1"], H, Hp)      # (Hp, 4Hp)
    b1 = bias_pack(p["b_ih1"], p["b_hh1"])  # (1, 4Hp)

    w2a = gate_pack(p["w_ih2"], H, Hp)      # (Hp, 4Hp)  <- relu(h1)
    w2b = gate_pack(p["w_hh2"], H, Hp)      # (Hp, 4Hp)  <- h2
    b2 = bias_pack(p["b_ih2"], p["b_hh2"])  # (1, 4Hp)

    wf = np.zeros((Hp, 1), np.float32)
    wf[:H, 0] = np.asarray(p["w_fc"], np.float32)[0, :]
    bf = np.asarray(p["b_fc"], np.float32).reshape(1, 1)

    return tuple(jnp.asarray(a) for a in (w1x, w1h, b1, w2a, w2b, b2, wf, bf))


# ----------------------------------------------------------------------------
# Pure-JAX reference (mirrors PyTorch semantics) for correctness check
# ----------------------------------------------------------------------------
def lstm_ref(x, w_ih, w_hh, b_ih, b_hh):
    H = w_hh.shape[1]
    B = x.shape[1]

    def step(carry, xt):
        h, c = carry
        gates = xt @ w_ih.T + h @ w_hh.T + b_ih + b_hh
        i, f, g, o = jnp.split(gates, 4, axis=-1)
        i, f, g, o = jax.nn.sigmoid(i), jax.nn.sigmoid(f), jnp.tanh(g), jax.nn.sigmoid(o)
        c = f * c + i * g
        h = o * jnp.tanh(c)
        return (h, c), h

    init = (jnp.zeros((B, H), jnp.float32), jnp.zeros((B, H), jnp.float32))
    _, hs = jax.lax.scan(step, init, x)
    return hs


def model3_ref(x, p):
    o = lstm_ref(x, p["w_ih1"], p["w_hh1"], p["b_ih1"], p["b_hh1"])
    o = jnp.maximum(o, 0.0)
    o = lstm_ref(o, p["w_ih2"], p["w_hh2"], p["b_ih2"], p["b_hh2"])
    o = jnp.maximum(o, 0.0)
    return o @ p["w_fc"].T + p["b_fc"]


if __name__ == "__main__":
    key = jax.random.PRNGKey(0)
    kp, kx = jax.random.split(key)

    seq, batch = 8, 2
    params = init_params(kp)
    kparams = to_kernel_params(params)

    x = jax.random.normal(kx, (seq, batch, INPUT), dtype=jnp.float32)

    out = jax.block_until_ready(model3_forward(x, kparams))
    ref = jax.block_until_ready(model3_ref(x, params))

    assert out.shape == (seq, batch, 1), out.shape
    np.testing.assert_allclose(np.asarray(out), np.asarray(ref),
                               atol=2e-5, rtol=1e-4)

    print("KERNEL_OK")
</pallas_src>

<mosaic_0001>
module attributes {stable_mosaic.version = 11 : i64} {
  func.func @kernel(%arg0: i32, %arg1: memref<64x4xf32, #tpu.memory_space<vmem>>, %arg2: memref<4x256xf32, #tpu.memory_space<vmem>>, %arg3: memref<64x256xf32, #tpu.memory_space<vmem>>, %arg4: memref<1x256xf32, #tpu.memory_space<vmem>>, %arg5: memref<64x256xf32, #tpu.memory_space<vmem>>, %arg6: memref<64x256xf32, #tpu.memory_space<vmem>>, %arg7: memref<1x256xf32, #tpu.memory_space<vmem>>, %arg8: memref<64x1xf32, #tpu.memory_space<vmem>>, %arg9: memref<1x1xf32, #tpu.memory_space<vmem>>, %arg10: memref<64x1xf32, #tpu.memory_space<vmem>>) attributes {dimension_semantics = [#tpu.dimension_semantics<arbitrary>], iteration_bounds = array<i64: 1>, scalar_prefetch = 0 : i64, scratch_operands = 0 : i64, tpu.core_type = #tpu.core_type<tc>, window_params = [{pipeline_mode = #tpu.pipeline_mode<synchronous>, transform_indices = @transform_0, window_bounds = array<i64: 64, 4>}, {pipeline_mode = #tpu.pipeline_mode<synchronous>, transform_indices = @transform_1, window_bounds = array<i64: 4, 256>}, {pipeline_mode = #tpu.pipeline_mode<synchronous>, transform_indices = @transform_2, window_bounds = array<i64: 64, 256>}, {pipeline_mode = #tpu.pipeline_mode<synchronous>, transform_indices = @transform_3, window_bounds = array<i64: 1, 256>}, {pipeline_mode = #tpu.pipeline_mode<synchronous>, transform_indices = @transform_4, window_bounds = array<i64: 64, 256>}, {pipeline_mode = #tpu.pipeline_mode<synchronous>, transform_indices = @transform_5, window_bounds = array<i64: 64, 256>}, {pipeline_mode = #tpu.pipeline_mode<synchronous>, transform_indices = @transform_6, window_bounds = array<i64: 1, 256>}, {pipeline_mode = #tpu.pipeline_mode<synchronous>, transform_indices = @transform_7, window_bounds = array<i64: 64, 1>}, {pipeline_mode = #tpu.pipeline_mode<synchronous>, transform_indices = @transform_8, window_bounds = array<i64: 1, 1>}, {pipeline_mode = #tpu.pipeline_mode<synchronous>, transform_indices = @transform_9, window_bounds = array<i64: 64, 1>}]} {
    %c0 = arith.constant 0 : index
    %c0_0 = arith.constant 0 : index
    %0 = vector.load %arg1[%c0, %c0_0] : memref<64x4xf32, #tpu.memory_space<vmem>>, vector<64x4xf32>
    %c0_1 = arith.constant 0 : index
    %c0_2 = arith.constant 0 : index
    %1 = vector.load %arg2[%c0_1, %c0_2] : memref<4x256xf32, #tpu.memory_space<vmem>>, vector<4x256xf32>
    %cst = arith.constant dense<0.000000e+00> : vector<64x256xf32>
    %2 = tpu.matmul %0, %1, %cst {dimension_numbers = #tpu.dot_dimension_numbers<[1], [0], [0], [1], [0, 0, 1, 1], [], []>} : vector<64x4xf32>, vector<4x256xf32>, vector<64x256xf32> -> vector<64x256xf32>
    %c0_3 = arith.constant 0 : index
    %c0_4 = arith.constant 0 : index
    %3 = vector.load %arg4[%c0_3, %c0_4] : memref<1x256xf32, #tpu.memory_space<vmem>>, vector<1x256xf32>
    %4 = vector.broadcast %3 : vector<1x256xf32> to vector<64x256xf32>
    %5 = arith.addf %2, %4 : vector<64x256xf32>
    %c0_5 = arith.constant 0 : index
    %c0_6 = arith.constant 0 : index
    %6 = vector.load %arg3[%c0_5, %c0_6] : memref<64x256xf32, #tpu.memory_space<vmem>>, vector<64x256xf32>
    %c0_7 = arith.constant 0 : index
    %c0_8 = arith.constant 0 : index
    %7 = vector.load %arg5[%c0_7, %c0_8] : memref<64x256xf32, #tpu.memory_space<vmem>>, vector<64x256xf32>
    %c0_9 = arith.constant 0 : index
    %c0_10 = arith.constant 0 : index
    %8 = vector.load %arg6[%c0_9, %c0_10] : memref<64x256xf32, #tpu.memory_space<vmem>>, vector<64x256xf32>
    %c0_11 = arith.constant 0 : index
    %c0_12 = arith.constant 0 : index
    %9 = vector.load %arg7[%c0_11, %c0_12] : memref<1x256xf32, #tpu.memory_space<vmem>>, vector<1x256xf32>
    %cst_13 = arith.constant 0.000000e+00 : f32
    %10 = vector.broadcast %cst_13 : f32 to vector<8x64xf32>
    %11 = vector.extract_strided_slice %5 {offsets = [0, 0], sizes = [8, 256], strides = [1, 1]} : vector<64x256xf32> to vector<8x256xf32>
    %cst_14 = arith.constant dense<0.000000e+00> : vector<8x256xf32>
    %12 = tpu.matmul %10, %6, %cst_14 {dimension_numbers = #tpu.dot_dimension_numbers<[1], [0], [0], [1], [0, 0, 1, 1], [], []>} : vector<8x64xf32>, vector<64x256xf32>, vector<8x256xf32> -> vector<8x256xf32>
    %13 = arith.addf %11, %12 : vector<8x256xf32>
    %14 = vector.extract_strided_slice %13 {offsets = [0, 0], sizes = [8, 192], strides = [1, 1]} : vector<8x256xf32> to vector<8x192xf32>
    %15 = arith.negf %14 : vector<8x192xf32>
    %16 = math.exp %15 : vector<8x192xf32>
    %cst_15 = arith.constant 1.000000e+00 : f32
    %17 = vector.broadcast %cst_15 : f32 to vector<8x192xf32>
    %18 = arith.addf %17, %16 : vector<8x192xf32>
    %19 = arith.divf %17, %18 : vector<8x192xf32>
    %20 = vector.extract_strided_slice %13 {offsets = [0, 192], sizes = [8, 64], strides = [1, 1]} : vector<8x256xf32> to vector<8x64xf32>
    %21 = math.tanh %20 : vector<8x64xf32>
    %22 = vector.extract_strided_slice %19 {offsets = [0, 0], sizes = [8, 64], strides = [1, 1]} : vector<8x192xf32> to vector<8x64xf32>
    %23 = vector.extract_strided_slice %19 {offsets = [0, 64], sizes = [8, 64], strides = [1, 1]} : vector<8x192xf32> to vector<8x64xf32>
    %24 = vector.extract_strided_slice %19 {offsets = [0, 128], sizes = [8, 64], strides = [1, 1]} : vector<8x192xf32> to vector<8x64xf32>
    %25 = arith.mulf %23, %10 : vector<8x64xf32>
    %26 = arith.mulf %22, %21 : vector<8x64xf32>
    %27 = arith.addf %25, %26 : vector<8x64xf32>
    %28 = math.tanh %27 : vector<8x64xf32>
    %29 = arith.mulf %24, %28 : vector<8x64xf32>
    %cst_16 = arith.constant 0.000000e+00 : f32
    %30 = vector.broadcast %cst_16 : f32 to vector<8x64xf32>
    %31 = arith.maximumf %29, %30 : vector<8x64xf32>
    %cst_17 = arith.constant dense<0.000000e+00> : vector<8x256xf32>
    %32 = tpu.matmul %31, %7, %cst_17 {dimension_numbers = #tpu.dot_dimension_numbers<[1], [0], [0], [1], [0, 0, 1, 1], [], []>} : vector<8x64xf32>, vector<64x256xf32>, vector<8x256xf32> -> vector<8x256xf32>
    %cst_18 = arith.constant dense<0.000000e+00> : vector<8x256xf32>
    %33 = tpu.matmul %10, %8, %cst_18 {dimension_numbers = #tpu.dot_dimension_numbers<[1], [0], [0], [1], [0, 0, 1, 1], [], []>} : vector<8x64xf32>, vector<64x256xf32>, vector<8x256xf32> -> vector<8x256xf32>
    %34 = arith.addf %32, %33 : vector<8x256xf32>
    %35 = vector.broadcast %9 : vector<1x256xf32> to vector<8x256xf32>
    %36 = arith.addf %34, %35 : vector<8x256xf32>
    %37 = vector.extract_strided_slice %36 {offsets = [0, 0], sizes = [8, 192], strides = [1, 1]} : vector<8x256xf32> to vector<8x192xf32>
    %38 = arith.negf %37 : vector<8x192xf32>
    %39 = math.exp %38 : vector<8x192xf32>
    %cst_19 = arith.constant 1.000000e+00 : f32
    %40 = vector.broadcast %cst_19 : f32 to vector<8x192xf32>
    %41 = arith.addf %40, %39 : vector<8x192xf32>
    %42 = arith.divf %40, %41 : vector<8x192xf32>
    %43 = vector.extract_strided_slice %36 {offsets = [0, 192], sizes = [8, 64], strides = [1, 1]} : vector<8x256xf32> to vector<8x64xf32>
    %44 = math.tanh %43 : vector<8x64xf32>
    %45 = vector.extract_strided_slice %42 {offsets = [0, 0], sizes = [8, 64], strides = [1, 1]} : vector<8x192xf32> to vector<8x64xf32>
    %46 = vector.extract_strided_slice %42 {offsets = [0, 64], sizes = [8, 64], strides = [1, 1]} : vector<8x192xf32> to vector<8x64xf32>
    %47 = vector.extract_strided_slice %42 {offsets = [0, 128], sizes = [8, 64], strides = [1, 1]} : vector<8x192xf32> to vector<8x64xf32>
    %48 = arith.mulf %46, %10 : vector<8x64xf32>
    %49 = arith.mulf %45, %44 : vector<8x64xf32>
    %50 = arith.addf %48, %49 : vector<8x64xf32>
    %51 = math.tanh %50 : vector<8x64xf32>
    %52 = arith.mulf %47, %51 : vector<8x64xf32>
    %cst_20 = arith.constant 0.000000e+00 : f32
    %53 = vector.broadcast %cst_20 : f32 to vector<8x64xf32>
    %54 = arith.maximumf %52, %53 : vector<8x64xf32>
    %55 = vector.extract_strided_slice %5 {offsets = [8, 0], sizes = [8, 256], strides = [1, 1]} : vector<64x256xf32> to vector<8x256xf32>
    %cst_21 = arith.constant dense<0.000000e+00> : vector<8x256xf32>
    %56 = tpu.matmul %29, %6, %cst_21 {dimension_numbers = #tpu.dot_dimension_numbers<[1], [0], [0], [1], [0, 0, 1, 1], [], []>} : vector<8x64xf32>, vector<64x256xf32>, vector<8x256xf32> -> vector<8x256xf32>
    %57 = arith.addf %55, %56 : vector<8x256xf32>
    %58 = vector.extract_strided_slice %57 {offsets = [0, 0], sizes = [8, 192], strides = [1, 1]} : vector<8x256xf32> to vector<8x192xf32>
    %59 = arith.negf %58 : vector<8x192xf32>
    %60 = math.exp %59 : vector<8x192xf32>
    %cst_22 = arith.constant 1.000000e+00 : f32
    %61 = vector.broadcast %cst_22 : f32 to vector<8x192xf32>
    %62 = arith.addf %61, %60 : vector<8x192xf32>
    %63 = arith.divf %61, %62 : vector<8x192xf32>
    %64 = vector.extract_strided_slice %57 {offsets = [0, 192], sizes = [8, 64], strides = [1, 1]} : vector<8x256xf32> to vector<8x64xf32>
    %65 = math.tanh %64 : vector<8x64xf32>
    %66 = vector.extract_strided_slice %63 {offsets = [0, 0], sizes = [8, 64], strides = [1, 1]} : vector<8x192xf32> to vector<8x64xf32>
    %67 = vector.extract_strided_slice %63 {offsets = [0, 64], sizes = [8, 64], strides = [1, 1]} : vector<8x192xf32> to vector<8x64xf32>
    %68 = vector.extract_strided_slice %63 {offsets = [0, 128], sizes = [8, 64], strides = [1, 1]} : vector<8x192xf32> to vector<8x64xf32>
    %69 = arith.mulf %67, %27 : vector<8x64xf32>
    %70 = arith.mulf %66, %65 : vector<8x64xf32>
    %71 = arith.addf %69, %70 : vector<8x64xf32>
    %72 = math.tanh %71 : vector<8x64xf32>
    %73 = arith.mulf %68, %72 : vector<8x64xf32>
    %cst_23 = arith.constant 0.000000e+00 : f32
    %74 = vector.broadcast %cst_23 : f32 to vector<8x64xf32>
    %75 = arith.maximumf %73, %74 : vector<8x64xf32>
    %cst_24 = arith.constant dense<0.000000e+00> : vector<8x256xf32>
    %76 = tpu.matmul %75, %7, %cst_24 {dimension_numbers = #tpu.dot_dimension_numbers<[1], [0], [0], [1], [0, 0, 1, 1], [], []>} : vector<8x64xf32>, vector<64x256xf32>, vector<8x256xf32> -> vector<8x256xf32>
    %cst_25 = arith.constant dense<0.000000e+00> : vector<8x256xf32>
    %77 = tpu.matmul %52, %8, %cst_25 {dimension_numbers = #tpu.dot_dimension_numbers<[1], [0], [0], [1], [0, 0, 1, 1], [], []>} : vector<8x64xf32>, vector<64x256xf32>, vector<8x256xf32> -> vector<8x256xf32>
    %78 = arith.addf %76, %77 : vector<8x256xf32>
    %79 = vector.broadcast %9 : vector<1x256xf32> to vector<8x256xf32>
    %80 = arith.addf %78, %79 : vector<8x256xf32>
    %81 = vector.extract_strided_slice %80 {offsets = [0, 0], sizes = [8, 192], strides = [1, 1]} : vector<8x256xf32> to vector<8x192xf32>
    %82 = arith.negf %81 : vector<8x192xf32>
    %83 = math.exp %82 : vector<8x192xf32>
    %cst_26 = arith.constant 1.000000e+00 : f32
    %84 = vector.broadcast %cst_26 : f32 to vector<8x192xf32>
    %85 = arith.addf %84, %83 : vector<8x192xf32>
    %86 = arith.divf %84, %85 : vector<8x192xf32>
    %87 = vector.extract_strided_slice %80 {offsets = [0, 192], sizes = [8, 64], strides = [1, 1]} : vector<8x256xf32> to vector<8x64xf32>
    %88 = math.tanh %87 : vector<8x64xf32>
    %89 = vector.extract_strided_slice %86 {offsets = [0, 0], sizes = [8, 64], strides = [1, 1]} : vector<8x192xf32> to vector<8x64xf32>
    %90 = vector.extract_strided_slice %86 {offsets = [0, 64], sizes = [8, 64], strides = [1, 1]} : vector<8x192xf32> to vector<8x64xf32>
    %91 = vector.extract_strided_slice %86 {offsets = [0, 128], sizes = [8, 64], strides = [1, 1]} : vector<8x192xf32> to vector<8x64xf32>
    %92 = arith.mulf %90, %50 : vector<8x64xf32>
    %93 = arith.mulf %89, %88 : vector<8x64xf32>
    %94 = arith.addf %92, %93 : vector<8x64xf32>
    %95 = math.tanh %94 : vector<8x64xf32>
    %96 = arith.mulf %91, %95 : vector<8x64xf32>
    %cst_27 = arith.constant 0.000000e+00 : f32
    %97 = vector.broadcast %cst_27 : f32 to vector<8x64xf32>
    %98 = arith.maximumf %96, %97 : vector<8x64xf32>
    %99 = vector.extract_strided_slice %5 {offsets = [16, 0], sizes = [8, 256], strides = [1, 1]} : vector<64x256xf32> to vector<8x256xf32>
    %cst_28 = arith.constant dense<0.000000e+00> : vector<8x256xf32>
    %100 = tpu.matmul %73, %6, %cst_28 {dimension_numbers = #tpu.dot_dimension_numbers<[1], [0], [0], [1], [0, 0, 1, 1], [], []>} : vector<8x64xf32>, vector<64x256xf32>, vector<8x256xf32> -> vector<8x256xf32>
    %101 = arith.addf %99, %100 : vector<8x256xf32>
    %102 = vector.extract_strided_slice %101 {offsets = [0, 0], sizes = [8, 192], strides = [1, 1]} : vector<8x256xf32> to vector<8x192xf32>
    %103 = arith.negf %102 : vector<8x192xf32>
    %104 = math.exp %103 : vector<8x192xf32>
    %cst_29 = arith.constant 1.000000e+00 : f32
    %105 = vector.broadcast %cst_29 : f32 to vector<8x192xf32>
    %106 = arith.addf %105, %104 : vector<8x192xf32>
    %107 = arith.divf %105, %106 : vector<8x192xf32>
    %108 = vector.extract_strided_slice %101 {offsets = [0, 192], sizes = [8, 64], strides = [1, 1]} : vector<8x256xf32> to vector<8x64xf32>
    %109 = math.tanh %108 : vector<8x64xf32>
    %110 = vector.extract_strided_slice %107 {offsets = [0, 0], sizes = [8, 64], strides = [1, 1]} : vector<8x192xf32> to vector<8x64xf32>
    %111 = vector.extract_strided_slice %107 {offsets = [0, 64], sizes = [8, 64], strides = [1, 1]} : vector<8x192xf32> to vector<8x64xf32>
    %112 = vector.extract_strided_slice %107 {offsets = [0, 128], sizes = [8, 64], strides = [1, 1]} : vector<8x192xf32> to vector<8x64xf32>
    %113 = arith.mulf %111, %71 : vector<8x64xf32>
    %114 = arith.mulf %110, %109 : vector<8x64xf32>
    %115 = arith.addf %113, %114 : vector<8x64xf32>
    %116 = math.tanh %115 : vector<8x64xf32>
    %117 = arith.mulf %112, %116 : vector<8x64xf32>
    %cst_30 = arith.constant 0.000000e+00 : f32
    %118 = vector.broadcast %cst_30 : f32 to vector<8x64xf32>
    %119 = arith.maximumf %117, %118 : vector<8x64xf32>
    %cst_31 = arith.constant dense<0.000000e+00> : vector<8x256xf32>
    %120 = tpu.matmul %119, %7, %cst_31 {dimension_numbers = #tpu.dot_dimension_numbers<[1], [0], [0], [1], [0, 0, 1, 1], [], []>} : vector<8x64xf32>, vector<64x256xf32>, vector<8x256xf32> -> vector<8x256xf32>
    %cst_32 = arith.constant dense<0.000000e+00> : vector<8x256xf32>
    %121 = tpu.matmul %96, %8, %cst_32 {dimension_numbers = #tpu.dot_dimension_numbers<[1], [0], [0], [1], [0, 0, 1, 1], [], []>} : vector<8x64xf32>, vector<64x256xf32>, vector<8x256xf32> -> vector<8x256xf32>
    %122 = arith.addf %120, %121 : vector<8x256xf32>
    %123 = vector.broadcast %9 : vector<1x256xf32> to vector<8x256xf32>
    %124 = arith.addf %122, %123 : vector<8x256xf32>
    %125 = vector.extract_strided_slice %124 {offsets = [0, 0], sizes = [8, 192], strides = [1, 1]} : vector<8x256xf32> to vector<8x192xf32>
    %126 = arith.negf %125 : vector<8x192xf32>
    %127 = math.exp %126 : vector<8x192xf32>
    %cst_33 = arith.constant 1.000000e+00 : f32
    %128 = vector.broadcast %cst_33 : f32 to vector<8x192xf32>
    %129 = arith.addf %128, %127 : vector<8x192xf32>
    %130 = arith.divf %128, %129 : vector<8x192xf32>
    %131 = vector.extract_strided_slice %124 {offsets = [0, 192], sizes = [8, 64], strides = [1, 1]} : vector<8x256xf32> to vector<8x64xf32>
    %132 = math.tanh %131 : vector<8x64xf32>
    %133 = vector.extract_strided_slice %130 {offsets = [0, 0], sizes = [8, 64], strides = [1, 1]} : vector<8x192xf32> to vector<8x64xf32>
    %134 = vector.extract_strided_slice %130 {offsets = [0, 64], sizes = [8, 64], strides = [1, 1]} : vector<8x192xf32> to vector<8x64xf32>
    %135 = vector.extract_strided_slice %130 {offsets = [0, 128], sizes = [8, 64], strides = [1, 1]} : vector<8x192xf32> to vector<8x64xf32>
    %136 = arith.mulf %134, %94 : vector<8x64xf32>
    %137 = arith.mulf %133, %132 : vector<8x64xf32>
    %138 = arith.addf %136, %137 : vector<8x64xf32>
    %139 = math.tanh %138 : vector<8x64xf32>
    %140 = arith.mulf %135, %139 : vector<8x64xf32>
    %cst_34 = arith.constant 0.000000e+00 : f32
    %141 = vector.broadcast %cst_34 : f32 to vector<8x64xf32>
    %142 = arith.maximumf %140, %141 : vector<8x64xf32>
    %143 = vector.extract_strided_slice %5 {offsets = [24, 0], sizes = [8, 256], strides = [1, 1]} : vector<64x256xf32> to vector<8x256xf32>
    %cst_35 = arith.constant dense<0.000000e+00> : vector<8x256xf32>
    %144 = tpu.matmul %117, %6, %cst_35 {dimension_numbers = #tpu.dot_dimension_numbers<[1], [0], [0], [1], [0, 0, 1, 1], [], []>} : vector<8x64xf32>, vector<64x256xf32>, vector<8x256xf32> -> vector<8x256xf32>
    %145 = arith.addf %143, %144 : vector<8x256xf32>
    %146 = vector.extract_strided_slice %145 {offsets = [0, 0], sizes = [8, 192], strides = [1, 1]} : vector<8x256xf32> to vector<8x192xf32>
    %147 = arith.negf %146 : vector<8x192xf32>
    %148 = math.exp %147 : vector<8x192xf32>
    %cst_36 = arith.constant 1.000000e+00 : f32
    %149 = vector.broadcast %cst_36 : f32 to vector<8x192xf32>
    %150 = arith.addf %149, %148 : vector<8x192xf32>
    %151 = arith.divf %149, %150 : vector<8x192xf32>
    %152 = vector.extract_strided_slice %145 {offsets = [0, 192], sizes = [8, 64], strides = [1, 1]} : vector<8x256xf32> to vector<8x64xf32>
    %153 = math.tanh %152 : vector<8x64xf32>
    %154 = vector.extract_strided_slice %151 {offsets = [0, 0], sizes = [8, 64], strides = [1, 1]} : vector<8x192xf32> to vector<8x64xf32>
    %155 = vector.extract_strided_slice %151 {offsets = [0, 64], sizes = [8, 64], strides = [1, 1]} : vector<8x192xf32> to vector<8x64xf32>
    %156 = vector.extract_strided_slice %151 {offsets = [0, 128], sizes = [8, 64], strides = [1, 1]} : vector<8x192xf32> to vector<8x64xf32>
    %157 = arith.mulf %155, %115 : vector<8x64xf32>
    %158 = arith.mulf %154, %153 : vector<8x64xf32>
    %159 = arith.addf %157, %158 : vector<8x64xf32>
    %160 = math.tanh %159 : vector<8x64xf32>
    %161 = arith.mulf %156, %160 : vector<8x64xf32>
    %cst_37 = arith.constant 0.000000e+00 : f32
    %162 = vector.broadcast %cst_37 : f32 to vector<8x64xf32>
    %163 = arith.maximumf %161, %162 : vector<8x64xf32>
    %cst_38 = arith.constant dense<0.000000e+00> : vector<8x256xf32>
    %164 = tpu.matmul %163, %7, %cst_38 {dimension_numbers = #tpu.dot_dimension_numbers<[1], [0], [0], [1], [0, 0, 1, 1], [], []>} : vector<8x64xf32>, vector<64x256xf32>, vector<8x256xf32> -> vector<8x256xf32>
    %cst_39 = arith.constant dense<0.000000e+00> : vector<8x256xf32>
    %165 = tpu.matmul %140, %8, %cst_39 {dimension_numbers = #tpu.dot_dimension_numbers<[1], [0], [0], [1], [0, 0, 1, 1], [], []>} : vector<8x64xf32>, vector<64x256xf32>, vector<8x256xf32> -> vector<8x256xf32>
    %166 = arith.addf %164, %165 : vector<8x256xf32>
    %167 = vector.broadcast %9 : vector<1x256xf32> to vector<8x256xf32>
    %168 = arith.addf %166, %167 : vector<8x256xf32>
    %169 = vector.extract_strided_slice %168 {offsets = [0, 0], sizes = [8, 192], strides = [1, 1]} : vector<8x256xf32> to vector<8x192xf32>
    %170 = arith.negf %169 : vector<8x192xf32>
    %171 = math.exp %170 : vector<8x192xf32>
    %cst_40 = arith.constant 1.000000e+00 : f32
    %172 = vector.broadcast %cst_40 : f32 to vector<8x192xf32>
    %173 = arith.addf %172, %171 : vector<8x192xf32>
    %174 = arith.divf %172, %173 : vector<8x192xf32>
    %175 = vector.extract_strided_slice %168 {offsets = [0, 192], sizes = [8, 64], strides = [1, 1]} : vector<8x256xf32> to vector<8x64xf32>
    %176 = math.tanh %175 : vector<8x64xf32>
    %177 = vector.extract_strided_slice %174 {offsets = [0, 0], sizes = [8, 64], strides = [1, 1]} : vector<8x192xf32> to vector<8x64xf32>
    %178 = vector.extract_strided_slice %174 {offsets = [0, 64], sizes = [8, 64], strides = [1, 1]} : vector<8x192xf32> to vector<8x64xf32>
    %179 = vector.extract_strided_slice %174 {offsets = [0, 128], sizes = [8, 64], strides = [1, 1]} : vector<8x192xf32> to vector<8x64xf32>
    %180 = arith.mulf %178, %138 : vector<8x64xf32>
    %181 = arith.mulf %177, %176 : vector<8x64xf32>
    %182 = arith.addf %180, %181 : vector<8x64xf32>
    %183 = math.tanh %182 : vector<8x64xf32>
    %184 = arith.mulf %179, %183 : vector<8x64xf32>
    %cst_41 = arith.constant 0.000000e+00 : f32
    %185 = vector.broadcast %cst_41 : f32 to vector<8x64xf32>
    %186 = arith.maximumf %184, %185 : vector<8x64xf32>
    %187 = vector.extract_strided_slice %5 {offsets = [32, 0], sizes = [8, 256], strides = [1, 1]} : vector<64x256xf32> to vector<8x256xf32>
    %cst_42 = arith.constant dense<0.000000e+00> : vector<8x256xf32>
    %188 = tpu.matmul %161, %6, %cst_42 {dimension_numbers = #tpu.dot_dimension_numbers<[1], [0], [0], [1], [0, 0, 1, 1], [], []>} : vector<8x64xf32>, vector<64x256xf32>, vector<8x256xf32> -> vector<8x256xf32>
    %189 = arith.addf %187, %188 : vector<8x256xf32>
    %190 = vector.extract_strided_slice %189 {offsets = [0, 0], sizes = [8, 192], strides = [1, 1]} : vector<8x256xf32> to vector<8x192xf32>
    %191 = arith.negf %190 : vector<8x192xf32>
    %192 = math.exp %191 : vector<8x192xf32>
    %cst_43 = arith.constant 1.000000e+00 : f32
    %193 = vector.broadcast %cst_43 : f32 to vector<8x192xf32>
    %194 = arith.addf %193, %192 : vector<8x192xf32>
    %195 = arith.divf %193, %194 : vector<8x192xf32>
    %196 = vector.extract_strided_slice %189 {offsets = [0, 192], sizes = [8, 64], strides = [1, 1]} : vector<8x256xf32> to vector<8x64xf32>
    %197 = math.tanh %196 : vector<8x64xf32>
    %198 = vector.extract_strided_slice %195 {offsets = [0, 0], sizes = [8, 64], strides = [1, 1]} : vector<8x192xf32> to vector<8x64xf32>
    %199 = vector.extract_strided_slice %195 {offsets = [0, 64], sizes = [8, 64], strides = [1, 1]} : vector<8x192xf32> to vector<8x64xf32>
    %200 = vector.extract_strided_slice %195 {offsets = [0, 128], sizes = [8, 64], strides = [1, 1]} : vector<8x192xf32> to vector<8x64xf32>
    %201 = arith.mulf %199, %159 : vector<8x64xf32>
    %202 = arith.mulf %198, %197 : vector<8x64xf32>
    %203 = arith.addf %201, %202 : vector<8x64xf32>
    %204 = math.tanh %203 : vector<8x64xf32>
    %205 = arith.mulf %200, %204 : vector<8x64xf32>
    %cst_44 = arith.constant 0.000000e+00 : f32
    %206 = vector.broadcast %cst_44 : f32 to vector<8x64xf32>
    %207 = arith.maximumf %205, %206 : vector<8x64xf32>
    %cst_45 = arith.constant dense<0.000000e+00> : vector<8x256xf32>
    %208 = tpu.matmul %207, %7, %cst_45 {dimension_numbers = #tpu.dot_dimension_numbers<[1], [0], [0], [1], [0, 0, 1, 1], [], []>} : vector<8x64xf32>, vector<64x256xf32>, vector<8x256xf32> -> vector<8x256xf32>
    %cst_46 = arith.constant dense<0.000000e+00> : vector<8x256xf32>
    %209 = tpu.matmul %184, %8, %cst_46 {dimension_numbers = #tpu.dot_dimension_numbers<[1], [0], [0], [1], [0, 0, 1, 1], [], []>} : vector<8x64xf32>, vector<64x256xf32>, vector<8x256xf32> -> vector<8x256xf32>
    %210 = arith.addf %208, %209 : vector<8x256xf32>
    %211 = vector.broadcast %9 : vector<1x256xf32> to vector<8x256xf32>
    %212 = arith.addf %210, %211 : vector<8x256xf32>
    %213 = vector.extract_strided_slice %212 {offsets = [0, 0], sizes = [8, 192], strides = [1, 1]} : vector<8x256xf32> to vector<8x192xf32>
    %214 = arith.negf %213 : vector<8x192xf32>
    %215 = math.exp %214 : vector<8x192xf32>
    %cst_47 = arith.constant 1.000000e+00 : f32
    %216 = vector.broadcast %cst_47 : f32 to vector<8x192xf32>
    %217 = arith.addf %216, %215 : vector<8x192xf32>
    %218 = arith.divf %216, %217 : vector<8x192xf32>
    %219 = vector.extract_strided_slice %212 {offsets = [0, 192], sizes = [8, 64], strides = [1, 1]} : vector<8x256xf32> to vector<8x64xf32>
    %220 = math.tanh %219 : vector<8x64xf32>
    %221 = vector.extract_strided_slice %218 {offsets = [0, 0], sizes = [8, 64], strides = [1, 1]} : vector<8x192xf32> to vector<8x64xf32>
    %222 = vector.extract_strided_slice %218 {offsets = [0, 64], sizes = [8, 64], strides = [1, 1]} : vector<8x192xf32> to vector<8x64xf32>
    %223 = vector.extract_strided_slice %218 {offsets = [0, 128], sizes = [8, 64], strides = [1, 1]} : vector<8x192xf32> to vector<8x64xf32>
    %224 = arith.mulf %222, %182 : vector<8x64xf32>
    %225 = arith.mulf %221, %220 : vector<8x64xf32>
    %226 = arith.addf %224, %225 : vector<8x64xf32>
    %227 = math.tanh %226 : vector<8x64xf32>
    %228 = arith.mulf %223, %227 : vector<8x64xf32>
    %cst_48 = arith.constant 0.000000e+00 : f32
    %229 = vector.broadcast %cst_48 : f32 to vector<8x64xf32>
    %230 = arith.maximumf %228, %229 : vector<8x64xf32>
    %231 = vector.extract_strided_slice %5 {offsets = [40, 0], sizes = [8, 256], strides = [1, 1]} : vector<64x256xf32> to vector<8x256xf32>
    %cst_49 = arith.constant dense<0.000000e+00> : vector<8x256xf32>
    %232 = tpu.matmul %205, %6, %cst_49 {dimension_numbers = #tpu.dot_dimension_numbers<[1], [0], [0], [1], [0, 0, 1, 1], [], []>} : vector<8x64xf32>, vector<64x256xf32>, vector<8x256xf32> -> vector<8x256xf32>
    %233 = arith.addf %231, %232 : vector<8x256xf32>
    %234 = vector.extract_strided_slice %233 {offsets = [0, 0], sizes = [8, 192], strides = [1, 1]} : vector<8x256xf32> to vector<8x192xf32>
    %235 = arith.negf %234 : vector<8x192xf32>
    %236 = math.exp %235 : vector<8x192xf32>
    %cst_50 = arith.constant 1.000000e+00 : f32
    %237 = vector.broadcast %cst_50 : f32 to vector<8x192xf32>
    %238 = arith.addf %237, %236 : vector<8x192xf32>
    %239 = arith.divf %237, %238 : vector<8x192xf32>
    %240 = vector.extract_strided_slice %233 {offsets = [0, 192], sizes = [8, 64], strides = [1, 1]} : vector<8x256xf32> to vector<8x64xf32>
    %241 = math.tanh %240 : vector<8x64xf32>
    %242 = vector.extract_strided_slice %239 {offsets = [0, 0], sizes = [8, 64], strides = [1, 1]} : vector<8x192xf32> to vector<8x64xf32>
    %243 = vector.extract_strided_slice %239 {offsets = [0, 64], sizes = [8, 64], strides = [1, 1]} : vector<8x192xf32> to vector<8x64xf32>
    %244 = vector.extract_strided_slice %239 {offsets = [0, 128], sizes = [8, 64], strides = [1, 1]} : vector<8x192xf32> to vector<8x64xf32>
    %245 = arith.mulf %243, %203 : vector<8x64xf32>
    %246 = arith.mulf %242, %241 : vector<8x64xf32>
    %247 = arith.addf %245, %246 : vector<8x64xf32>
    %248 = math.tanh %247 : vector<8x64xf32>
    %249 = arith.mulf %244, %248 : vector<8x64xf32>
    %cst_51 = arith.constant 0.000000e+00 : f32
    %250 = vector.broadcast %cst_51 : f32 to vector<8x64xf32>
    %251 = arith.maximumf %249, %250 : vector<8x64xf32>
    %cst_52 = arith.constant dense<0.000000e+00> : vector<8x256xf32>
    %252 = tpu.matmul %251, %7, %cst_52 {dimension_numbers = #tpu.dot_dimension_numbers<[1], [0], [0], [1], [0, 0, 1, 1], [], []>} : vector<8x64xf32>, vector<64x256xf32>, vector<8x256xf32> -> vector<8x256xf32>
    %cst_53 = arith.constant dense<0.000000e+00> : vector<8x256xf32>
    %253 = tpu.matmul %228, %8, %cst_53 {dimension_numbers = #tpu.dot_dimension_numbers<[1], [0], [0], [1], [0, 0, 1, 1], [], []>} : vector<8x64xf32>, vector<64x256xf32>, vector<8x256xf32> -> vector<8x256xf32>
    %254 = arith.addf %252, %253 : vector<8x256xf32>
    %255 = vector.broadcast %9 : vector<1x256xf32> to vector<8x256xf32>
    %256 = arith.addf %254, %255 : vector<8x256xf32>
    %257 = vector.extract_strided_slice %256 {offsets = [0, 0], sizes = [8, 192], strides = [1, 1]} : vector<8x256xf32> to vector<8x192xf32>
    %258 = arith.negf %257 : vector<8x192xf32>
    %259 = math.exp %258 : vector<8x192xf32>
    %cst_54 = arith.constant 1.000000e+00 : f32
    %260 = vector.broadcast %cst_54 : f32 to vector<8x192xf32>
    %261 = arith.addf %260, %259 : vector<8x192xf32>
    %262 = arith.divf %260, %261 : vector<8x192xf32>
    %263 = vector.extract_strided_slice %256 {offsets = [0, 192], sizes = [8, 64], strides = [1, 1]} : vector<8x256xf32> to vector<8x64xf32>
    %264 = math.tanh %263 : vector<8x64xf32>
    %265 = vector.extract_strided_slice %262 {offsets = [0, 0], sizes = [8, 64], strides = [1, 1]} : vector<8x192xf32> to vector<8x64xf32>
    %266 = vector.extract_strided_slice %262 {offsets = [0, 64], sizes = [8, 64], strides = [1, 1]} : vector<8x192xf32> to vector<8x64xf32>
    %267 = vector.extract_strided_slice %262 {offsets = [0, 128], sizes = [8, 64], strides = [1, 1]} : vector<8x192xf32> to vector<8x64xf32>
    %268 = arith.mulf %266, %226 : vector<8x64xf32>
    %269 = arith.mulf %265, %264 : vector<8x64xf32>
    %270 = arith.addf %268, %269 : vector<8x64xf32>
    %271 = math.tanh %270 : vector<8x64xf32>
    %272 = arith.mulf %267, %271 : vector<8x64xf32>
    %cst_55 = arith.constant 0.000000e+00 : f32
    %273 = vector.broadcast %cst_55 : f32 to vector<8x64xf32>
    %274 = arith.maximumf %272, %273 : vector<8x64xf32>
    %275 = vector.extract_strided_slice %5 {offsets = [48, 0], sizes = [8, 256], strides = [1, 1]} : vector<64x256xf32> to vector<8x256xf32>
    %cst_56 = arith.constant dense<0.000000e+00> : vector<8x256xf32>
    %276 = tpu.matmul %249, %6, %cst_56 {dimension_numbers = #tpu.dot_dimension_numbers<[1], [0], [0], [1], [0, 0, 1, 1], [], []>} : vector<8x64xf32>, vector<64x256xf32>, vector<8x256xf32> -> vector<8x256xf32>
    %277 = arith.addf %275, %276 : vector<8x256xf32>
    %278 = vector.extract_strided_slice %277 {offsets = [0, 0], sizes = [8, 192], strides = [1, 1]} : vector<8x256xf32> to vector<8x192xf32>
    %279 = arith.negf %278 : vector<8x192xf32>
    %280 = math.exp %279 : vector<8x192xf32>
    %cst_57 = arith.constant 1.000000e+00 : f32
    %281 = vector.broadcast %cst_57 : f32 to vector<8x192xf32>
    %282 = arith.addf %281, %280 : vector<8x192xf32>
    %283 = arith.divf %281, %282 : vector<8x192xf32>
    %284 = vector.extract_strided_slice %277 {offsets = [0, 192], sizes = [8, 64], strides = [1, 1]} : vector<8x256xf32> to vector<8x64xf32>
    %285 = math.tanh %284 : vector<8x64xf32>
    %286 = vector.extract_strided_slice %283 {offsets = [0, 0], sizes = [8, 64], strides = [1, 1]} : vector<8x192xf32> to vector<8x64xf32>
    %287 = vector.extract_strided_slice %283 {offsets = [0, 64], sizes = [8, 64], strides = [1, 1]} : vector<8x192xf32> to vector<8x64xf32>
    %288 = vector.extract_strided_slice %283 {offsets = [0, 128], sizes = [8, 64], strides = [1, 1]} : vector<8x192xf32> to vector<8x64xf32>
    %289 = arith.mulf %287, %247 : vector<8x64xf32>
    %290 = arith.mulf %286, %285 : vector<8x64xf32>
    %291 = arith.addf %289, %290 : vector<8x64xf32>
    %292 = math.tanh %291 : vector<8x64xf32>
    %293 = arith.mulf %288, %292 : vector<8x64xf32>
    %cst_58 = arith.constant 0.000000e+00 : f32
    %294 = vector.broadcast %cst_58 : f32 to vector<8x64xf32>
    %295 = arith.maximumf %293, %294 : vector<8x64xf32>
    %cst_59 = arith.constant dense<0.000000e+00> : vector<8x256xf32>
    %296 = tpu.matmul %295, %7, %cst_59 {dimension_numbers = #tpu.dot_dimension_numbers<[1], [0], [0], [1], [0, 0, 1, 1], [], []>} : vector<8x64xf32>, vector<64x256xf32>, vector<8x256xf32> -> vector<8x256xf32>
    %cst_60 = arith.constant dense<0.000000e+00> : vector<8x256xf32>
    %297 = tpu.matmul %272, %8, %cst_60 {dimension_numbers = #tpu.dot_dimension_numbers<[1], [0], [0], [1], [0, 0, 1, 1], [], []>} : vector<8x64xf32>, vector<64x256xf32>, vector<8x256xf32> -> vector<8x256xf32>
    %298 = arith.addf %296, %297 : vector<8x256xf32>
    %299 = vector.broadcast %9 : vector<1x256xf32> to vector<8x256xf32>
    %300 = arith.addf %298, %299 : vector<8x256xf32>
    %301 = vector.extract_strided_slice %300 {offsets = [0, 0], sizes = [8, 192], strides = [1, 1]} : vector<8x256xf32> to vector<8x192xf32>
    %302 = arith.negf %301 : vector<8x192xf32>
    %303 = math.exp %302 : vector<8x192xf32>
    %cst_61 = arith.constant 1.000000e+00 : f32
    %304 = vector.broadcast %cst_61 : f32 to vector<8x192xf32>
    %305 = arith.addf %304, %303 : vector<8x192xf32>
    %306 = arith.divf %304, %305 : vector<8x192xf32>
    %307 = vector.extract_strided_slice %300 {offsets = [0, 192], sizes = [8, 64], strides = [1, 1]} : vector<8x256xf32> to vector<8x64xf32>
    %308 = math.tanh %307 : vector<8x64xf32>
    %309 = vector.extract_strided_slice %306 {offsets = [0, 0], sizes = [8, 64], strides = [1, 1]} : vector<8x192xf32> to vector<8x64xf32>
    %310 = vector.extract_strided_slice %306 {offsets = [0, 64], sizes = [8, 64], strides = [1, 1]} : vector<8x192xf32> to vector<8x64xf32>
    %311 = vector.extract_strided_slice %306 {offsets = [0, 128], sizes = [8, 64], strides = [1, 1]} : vector<8x192xf32> to vector<8x64xf32>
    %312 = arith.mulf %310, %270 : vector<8x64xf32>
    %313 = arith.mulf %309, %308 : vector<8x64xf32>
    %314 = arith.addf %312, %313 : vector<8x64xf32>
    %315 = math.tanh %314 : vector<8x64xf32>
    %316 = arith.mulf %311, %315 : vector<8x64xf32>
    %cst_62 = arith.constant 0.000000e+00 : f32
    %317 = vector.broadcast %cst_62 : f32 to vector<8x64xf32>
    %318 = arith.maximumf %316, %317 : vector<8x64xf32>
    %319 = vector.extract_strided_slice %5 {offsets = [56, 0], sizes = [8, 256], strides = [1, 1]} : vector<64x256xf32> to vector<8x256xf32>
    %cst_63 = arith.constant dense<0.000000e+00> : vector<8x256xf32>
    %320 = tpu.matmul %293, %6, %cst_63 {dimension_numbers = #tpu.dot_dimension_numbers<[1], [0], [0], [1], [0, 0, 1, 1], [], []>} : vector<8x64xf32>, vector<64x256xf32>, vector<8x256xf32> -> vector<8x256xf32>
    %321 = arith.addf %319, %320 : vector<8x256xf32>
    %322 = vector.extract_strided_slice %321 {offsets = [0, 0], sizes = [8, 192], strides = [1, 1]} : vector<8x256xf32> to vector<8x192xf32>
    %323 = arith.negf %322 : vector<8x192xf32>
    %324 = math.exp %323 : vector<8x192xf32>
    %cst_64 = arith.constant 1.000000e+00 : f32
    %325 = vector.broadcast %cst_64 : f32 to vector<8x192xf32>
    %326 = arith.addf %325, %324 : vector<8x192xf32>
    %327 = arith.divf %325, %326 : vector<8x192xf32>
    %328 = vector.extract_strided_slice %321 {offsets = [0, 192], sizes = [8, 64], strides = [1, 1]} : vector<8x256xf32> to vector<8x64xf32>
    %329 = math.tanh %328 : vector<8x64xf32>
    %330 = vector.extract_strided_slice %327 {offsets = [0, 0], sizes = [8, 64], strides = [1, 1]} : vector<8x192xf32> to vector<8x64xf32>
    %331 = vector.extract_strided_slice %327 {offsets = [0, 64], sizes = [8, 64], strides = [1, 1]} : vector<8x192xf32> to vector<8x64xf32>
    %332 = vector.extract_strided_slice %327 {offsets = [0, 128], sizes = [8, 64], strides = [1, 1]} : vector<8x192xf32> to vector<8x64xf32>
    %333 = arith.mulf %331, %291 : vector<8x64xf32>
    %334 = arith.mulf %330, %329 : vector<8x64xf32>
    %335 = arith.addf %333, %334 : vector<8x64xf32>
    %336 = math.tanh %335 : vector<8x64xf32>
    %337 = arith.mulf %332, %336 : vector<8x64xf32>
    %cst_65 = arith.constant 0.000000e+00 : f32
    %338 = vector.broadcast %cst_65 : f32 to vector<8x64xf32>
    %339 = arith.maximumf %337, %338 : vector<8x64xf32>
    %cst_66 = arith.constant dense<0.000000e+00> : vector<8x256xf32>
    %340 = tpu.matmul %339, %7, %cst_66 {dimension_numbers = #tpu.dot_dimension_numbers<[1], [0], [0], [1], [0, 0, 1, 1], [], []>} : vector<8x64xf32>, vector<64x256xf32>, vector<8x256xf32> -> vector<8x256xf32>
    %cst_67 = arith.constant dense<0.000000e+00> : vector<8x256xf32>
    %341 = tpu.matmul %316, %8, %cst_67 {dimension_numbers = #tpu.dot_dimension_numbers<[1], [0], [0], [1], [0, 0, 1, 1], [], []>} : vector<8x64xf32>, vector<64x256xf32>, vector<8x256xf32> -> vector<8x256xf32>
    %342 = arith.addf %340, %341 : vector<8x256xf32>
    %343 = vector.broadcast %9 : vector<1x256xf32> to vector<8x256xf32>
    %344 = arith.addf %342, %343 : vector<8x256xf32>
    %345 = vector.extract_strided_slice %344 {offsets = [0, 0], sizes = [8, 192], strides = [1, 1]} : vector<8x256xf32> to vector<8x192xf32>
    %346 = arith.negf %345 : vector<8x192xf32>
    %347 = math.exp %346 : vector<8x192xf32>
    %cst_68 = arith.constant 1.000000e+00 : f32
    %348 = vector.broadcast %cst_68 : f32 to vector<8x192xf32>
    %349 = arith.addf %348, %347 : vector<8x192xf32>
    %350 = arith.divf %348, %349 : vector<8x192xf32>
    %351 = vector.extract_strided_slice %344 {offsets = [0, 192], sizes = [8, 64], strides = [1, 1]} : vector<8x256xf32> to vector<8x64xf32>
    %352 = math.tanh %351 : vector<8x64xf32>
    %353 = vector.extract_strided_slice %350 {offsets = [0, 0], sizes = [8, 64], strides = [1, 1]} : vector<8x192xf32> to vector<8x64xf32>
    %354 = vector.extract_strided_slice %350 {offsets = [0, 64], sizes = [8, 64], strides = [1, 1]} : vector<8x192xf32> to vector<8x64xf32>
    %355 = vector.extract_strided_slice %350 {offsets = [0, 128], sizes = [8, 64], strides = [1, 1]} : vector<8x192xf32> to vector<8x64xf32>
    %356 = arith.mulf %354, %314 : vector<8x64xf32>
    %357 = arith.mulf %353, %352 : vector<8x64xf32>
    %358 = arith.addf %356, %357 : vector<8x64xf32>
    %359 = math.tanh %358 : vector<8x64xf32>
    %360 = arith.mulf %355, %359 : vector<8x64xf32>
    %cst_69 = arith.constant 0.000000e+00 : f32
    %361 = vector.broadcast %cst_69 : f32 to vector<8x64xf32>
    %362 = arith.maximumf %360, %361 : vector<8x64xf32>
    %363 = tpu.concatenate %54, %98, %142, %186, %230, %274, %318, %362 in 0 : vector<8x64xf32>, vector<8x64xf32>, vector<8x64xf32>, vector<8x64xf32>, vector<8x64xf32>, vector<8x64xf32>, vector<8x64xf32>, vector<8x64xf32> -> vector<64x64xf32>
    %c0_70 = arith.constant 0 : index
    %c0_71 = arith.constant 0 : index
    %364 = vector.load %arg8[%c0_70, %c0_71] : memref<64x1xf32, #tpu.memory_space<vmem>>, vector<64x1xf32>
    %cst_72 = arith.constant dense<0.000000e+00> : vector<64x1xf32>
    %365 = tpu.matmul %363, %364, %cst_72 {dimension_numbers = #tpu.dot_dimension_numbers<[1], [0], [0], [1], [0, 0, 1, 1], [], []>} : vector<64x64xf32>, vector<64x1xf32>, vector<64x1xf32> -> vector<64x1xf32>
    %c0_73 = arith.constant 0 : index
    %c0_74 = arith.constant 0 : index
    %366 = vector.load %arg9[%c0_73, %c0_74] : memref<1x1xf32, #tpu.memory_space<vmem>>, vector<1x1xf32>
    %367 = vector.broadcast %366 : vector<1x1xf32> to vector<64x1xf32>
    %368 = arith.addf %365, %367 : vector<64x1xf32>
    %c0_75 = arith.constant 0 : index
    %c0_76 = arith.constant 0 : index
    %369 = vector.load %arg10[%c0_75, %c0_76] : memref<64x1xf32, #tpu.memory_space<vmem>>, vector<64x1xf32>
    tpu.vector_store %arg10[%c0_75, %c0_76], %368 {strides = array<i32>} : memref<64x1xf32, #tpu.memory_space<vmem>>, vector<64x1xf32>,
    return
  }
  func.func @transform_0(%arg0: i32) -> (i32, i32) {
    %c0_i32 = arith.constant 0 : i32
    %c0_i32_0 = arith.constant 0 : i32
    %c0_i32_1 = arith.constant 0 : i32
    return %c0_i32, %c0_i32_0 : i32, i32
  }
  func.func @transform_1(%arg0: i32) -> (i32, i32) {
    %c0_i32 = arith.constant 0 : i32
    %c0_i32_0 = arith.constant 0 : i32
    %c0_i32_1 = arith.constant 0 : i32
    return %c0_i32, %c0_i32_0 : i32, i32
  }
  func.func @transform_2(%arg0: i32) -> (i32, i32) {
    %c0_i32 = arith.constant 0 : i32
    %c0_i32_0 = arith.constant 0 : i32
    %c0_i32_1 = arith.constant 0 : i32
    return %c0_i32, %c0_i32_0 : i32, i32
  }
  func.func @transform_3(%arg0: i32) -> (i32, i32) {
    %c0_i32 = arith.constant 0 : i32
    %c0_i32_0 = arith.constant 0 : i32
    %c0_i32_1 = arith.constant 0 : i32
    return %c0_i32, %c0_i32_0 : i32, i32
  }
  func.func @transform_4(%arg0: i32) -> (i32, i32) {
    %c0_i32 = arith.constant 0 : i32
    %c0_i32_0 = arith.constant 0 : i32
    %c0_i32_1 = arith.constant 0 : i32
    return %c0_i32, %c0_i32_0 : i32, i32
  }
  func.func @transform_5(%arg0: i32) -> (i32, i32) {
    %c0_i32 = arith.constant 0 : i32
    %c0_i32_0 = arith.constant 0 : i32
    %c0_i32_1 = arith.constant 0 : i32
    return %c0_i32, %c0_i32_0 : i32, i32
  }
  func.func @transform_6(%arg0: i32) -> (i32, i32) {
    %c0_i32 = arith.constant 0 : i32
    %c0_i32_0 = arith.constant 0 : i32
    %c0_i32_1 = arith.constant 0 : i32
    return %c0_i32, %c0_i32_0 : i32, i32
  }
  func.func @transform_7(%arg0: i32) -> (i32, i32) {
    %c0_i32 = arith.constant 0 : i32
    %c0_i32_0 = arith.constant 0 : i32
    %c0_i32_1 = arith.constant 0 : i32
    return %c0_i32, %c0_i32_0 : i32, i32
  }
  func.func @transform_8(%arg0: i32) -> (i32, i32) {
    %c0_i32 = arith.constant 0 : i32
    %c0_i32_0 = arith.constant 0 : i32
    %c0_i32_1 = arith.constant 0 : i32
    return %c0_i32, %c0_i32_0 : i32, i32
  }
  func.func @transform_9(%arg0: i32) -> (i32, i32) {
    %c0_i32 = arith.constant 0 : i32
    %c0_i32_0 = arith.constant 0 : i32
    %c0_i32_1 = arith.constant 0 : i32
    return %c0_i32, %c0_i32_0 : i32, i32
  }
}

</mosaic_0001>

<bundles_post_ra>
// kernel: tpu_custom_call.1
= control target key start
LH: loop header
LB: loop body
LE: loop exit
PB: predicated region body
PF: predicated region fallthrough
CT: control target
= control target key end

     0   :  { %s4287_s0 = inlined_call_operand.vmem [shape: f32[64,4], index: 0, kind: input, shape index: {}]   ;;  %s4288_s1 = inlined_call_operand.vmem [shape: f32[4,256], index: 1, kind: input, shape index: {}]   ;;  %s4289_s2 = inlined_call_operand.vmem [shape: f32[64,256], index: 2, kind: input, shape index: {}]   ;;  %s4290_s3 = inlined_call_operand.vmem [shape: f32[1,256], index: 3, kind: input, shape index: {}]   ;;  %s4291_s4 = inlined_call_operand.hbm [shape: f32[64,256], index: 4, kind: input, shape index: {}]   ;;  %s4292_s5 = inlined_call_operand.hbm [shape: f32[64,256], index: 5, kind: input, shape index: {}]   ;;  %s4293_s6 = inlined_call_operand.vmem [shape: f32[1,256], index: 6, kind: input, shape index: {}]   ;;  %s4294_s7 = inlined_call_operand.vmem [shape: f32[64,1], index: 7, kind: input, shape index: {}]   ;;  %s4295_s8 = inlined_call_operand.<no memory space> [shape: f32[1,1], index: 8, kind: input, shape index: {}]   ;;  %s4296_s9 = inlined_call_operand.vmem [shape: f32[64,1], index: 9, kind: output, shape index: {}]  }
   0x1   :  { %v14_v0 = vstv %s4295_s8 }
   0x2   :  { %15 = vst [vmem:[#allocation2] sm:$0x1] %v14_v0 }
   0x3   :  { %16 = vsyncpa [#allocation4], 0 }
   0x4   :  { %17 = vsyncpa [#allocation6], 0  ;;  %s3561_s11 = smov [#allocation3]   ;;  %s3513_s15 = scalar_lea.hbm %s4291_s4, 2048 }
   0x5   :  { %s31_s12 = sshll.u32 %s3561_s11, 4  ;;  %p3514_p0 = scmp.ne.s32.totalorder %s4291_s4, %s3513_s15  ;;  %s32_s12 = int_to_ptr.vmem [resolvable:$true] %s31_s12 }
   0x6   :  { %p3517_p1 = scmp.lt.u32.totalorder %s3513_s15, %s4291_s4 }
   0x8   :  { %p3519_p2 = pnand %p3517_p1, %p3514_p0 }
   0xa   :  { %3522 = shalt.err (!%p3519_p2)
}
   0xb   :  { %s3523_s8 = scalar_lea.vmem %s32_s12, 2048  ;;  %p3528_p4 = scmp.lt.s32.totalorder %s32_s12, %s32_s12 }
   0xc   :  { %p3524_p3 = scmp.ne.s32.totalorder %s32_s12, %s3523_s8  ;;  %p3529_p5 = scmp.lt.s32.totalorder %s3523_s8, %s3523_s8 }
   0xe   :  { %p3530_p6 = por %p3529_p5, %p3528_p4 }
  0x10   :  { %p3531_p7 = pnand %p3530_p6, %p3524_p3 }
  0x12   :  { %3534 = shalt.err (!%p3531_p7)
}
  0x13   :  { %s3562_s20 = smov 256   ;;  %s3563_s21 = smov 16  }
  0x14   :  { %37 = dma.hbm_to_vmem [thread:$0]  %s4291_s4, 2048, %s32_s12, [#allocation4], %s3562_s20, %s3562_s20, %s3563_s21  }
  0x15   :  { %s3564_s24 = smov [#allocation5]   ;;  %s3535_s28 = scalar_lea.hbm %s4292_s5, 2048 }
  0x16   :  { %s43_s25 = sshll.u32 %s3564_s24, 4  ;;  %p3536_p8 = scmp.ne.s32.totalorder %s4292_s5, %s3535_s28  ;;  %s44_s25 = int_to_ptr.vmem [resolvable:$true] %s43_s25 }
  0x17   :  { %p3539_p9 = scmp.lt.u32.totalorder %s3535_s28, %s4292_s5 }
  0x19   :  { %p3541_p10 = pnand %p3539_p9, %p3536_p8 }
  0x1b   :  { %3544 = shalt.err (!%p3541_p10)
}
  0x1c   :  { %s3545_s13 = scalar_lea.vmem %s44_s25, 2048  ;;  %p3550_p12 = scmp.lt.s32.totalorder %s44_s25, %s44_s25 }
  0x1d   :  { %p3546_p11 = scmp.ne.s32.totalorder %s44_s25, %s3545_s13  ;;  %p3551_p13 = scmp.lt.s32.totalorder %s3545_s13, %s3545_s13 }
  0x1f   :  { %p3552_p0 = por %p3551_p13, %p3550_p12 }
  0x21   :  { %p3553_p1 = pnand %p3552_p0, %p3546_p11 }
  0x23   :  { %3556 = shalt.err (!%p3553_p1)
}
  0x24   :  { %49 = dma.hbm_to_vmem [thread:$0]  %s4292_s5, 2048, %s44_s25, [#allocation6], %s3562_s20, %s3562_s20, %s3563_s21  }
  0x25   :  { %3557 = dma.done.wait [#allocation4], 2048  }
  0x26   :  { %3558 = vsyncadd [#allocation4], 4294965248 }
  0x27   :  { %3559 = dma.done.wait [#allocation6], 2048  }
  0x28   :  { %3560 = vsyncadd [#allocation6], 4294965248  ;;  %v3565_v1 = vmov 0.0   ;;  %v70_v2 = vld [vmem:[%s4288_s1] sm:$0xff]  ;;  %vm110_vm0 = vcmask 1043456   ;;  %v229_v3 = vld [vmem:[%s4289_s2 + $0x8] sm:$0xff]  ;;  %v73_v36 = vlaneseq }
  0x29   :  { %179 = vmatprep.mubr.f32.mxu0 %v3565_v1  ;;  %449 = vmatprep.mubr.f32.mxu1 %v3565_v1  ;;  %v84_v4 = vcombine.high %v70_v2, %v70_v2  ;;  %v231_v5 = vld [vmem:[%s4289_s2 + $0x18] sm:$0xff]  ;;  %v228_v6 = vld [vmem:[%s4289_s2] sm:$0xff]  ;;  %v230_v7 = vld [vmem:[%s4289_s2 + $0x10] sm:$0xff]  ;;  %vm85_vm1 = vcmask 31744   ;;  %s3566_s14 = smov 64   ;;  %vm277_vm2 = vcmask 523264  }
  0x2a   :  { %v62_v8 = vld [vmem:[%s4287_s0] sm:$0xff]  ;;  %v3664_v9 = vpack.c.bf16 %v231_v5, %v229_v3  ;;  %v3666_v10 = vpack.c.bf16 %v230_v7, %v228_v6  ;;  %v233_v11 = vld [vmem:[%s4289_s2 + $0x28] sm:$0xff]  ;;  %v235_v12 = vld [vmem:[%s4289_s2 + $0x38] sm:$0xff]  ;;  %v3772_v37 = vshrl.u32 %v73_v36, 7  ;;  %vm2734_vm3 = vcmask 7168  }
  0x2b   :  { %2749 = vmatprep.subr.msk.mxu0 %vm110_vm0, %v84_v4  ;;  %v232_v13 = vld [vmem:[%s4289_s2 + $0x20] sm:$0xff]  ;;  %v234_v14 = vld [vmem:[%s4289_s2 + $0x30] sm:$0xff]  ;;  %v3680_v15 = vpack.c.bf16 %v235_v12, %v233_v11  ;;  %v237_v16 = vld [vmem:[%s4289_s2 + $0x48] sm:$0xff] }
  0x2c   :  { %2750 = vmatpush1.msk.msra.mxu0 %vm110_vm0, %v70_v2  ;;  %v239_v17 = vld [vmem:[%s4289_s2 + $0x58] sm:$0xff]  ;;  %v63_v18 = vld [vmem:[%s4287_s0 + $0x8] sm:$0xff]  ;;  %v3695_v19 = vpack.c.bf16 %v234_v14, %v232_v13  ;;  %v236_v21 = vld [vmem:[%s4289_s2 + $0x40] sm:$0xff]  ;;  %v79_v38 = vsub.s32 1, %v3772_v37  ;;  %v75_v45 = vsub.s32 0, %v3772_v37 }
  0x2d   :  { %2751 = vmatmul.mubr.msk.f32.vlgmr.msra.gmra.mrb[0].mxu0 %vm85_vm1, %v62_v8  ;;  %2867 = vmatprep.subr.bf16.mxu0 %v3664_v9  ;;  %v3698_v20 = vpack.c.bf16 %v239_v17, %v237_v16  ;;  %v238_v22 = vld [vmem:[%s4289_s2 + $0x50] sm:$0xff]  ;;  %v241_v23 = vld [vmem:[%s4289_s2 + $0x68] sm:$0xff]  ;;  %v243_v24 = vld [vmem:[%s4289_s2 + $0x78] sm:$0xff] }
  0x2e   :  { %2869 = vmatpush1.bf16.msra.mxu0 %v3666_v10  ;;  %185 = vmatprep.mubr.f32.mxu0 %v3565_v1  ;;  %v64_v25 = vld [vmem:[%s4287_s0 + $0x10] sm:$0xff]  ;;  %v3718_v26 = vpack.c.bf16 %v238_v22, %v236_v21  ;;  %v3721_v27 = vpack.c.bf16 %v243_v24, %v241_v23  ;;  %v240_v28 = vld [vmem:[%s4289_s2 + $0x60] sm:$0xff]  ;;  %v65_v30 = vld [vmem:[%s4287_s0 + $0x18] sm:$0xff] }
  0x2f   :  { %2871 = vmatprep.subr.bf16.mxu0 %v3680_v15  ;;  %v242_v29 = vld [vmem:[%s4289_s2 + $0x70] sm:$0xff]  ;;  %v66_v32 = vld [vmem:[%s4287_s0 + $0x20] sm:$0xff]  ;;  %v67_v33 = vld [vmem:[%s4287_s0 + $0x28] sm:$0xff] }
  0x30   :  { %v3735_v31 = vpack.c.bf16 %v242_v29, %v240_v28  ;;  %v68_v34 = vld [vmem:[%s4287_s0 + $0x30] sm:$0xff]  ;;  %v69_v35 = vld [vmem:[%s4287_s0 + $0x38] sm:$0xff]  ;;  %v71_v39 = vld [vmem:[%s4290_s3] sm:$0x3] }
  0x31   :  { %2752 = vmatmul.mubr.msk.f32.gmra.mrb[2].mxu0 %vm85_vm1, %v63_v18  ;;  %v3780_v40 = vrot.slane %v71_v39, %v79_v38  ;;  %v3790_v46 = vrot.slane %v71_v39, %v75_v45  ;;  %v261_v54 = vld [vmem:[#allocation5 + $0x8] sm:$0xff]  ;;  %v263_v55 = vld [vmem:[#allocation5 + $0x18] sm:$0xff]  ;;  %v260_v56 = vld [vmem:[#allocation5] sm:$0xff] }
  0x32   :  { %191 = vmatprep.mubr.f32.mxu0 %v3565_v1  ;;  %2873 = vmatpush1.bf16.msra.mxu0 %v3695_v19  ;;  %v3797_v57 = vpack.c.bf16 %v263_v55, %v261_v54  ;;  %v262_v58 = vld [vmem:[#allocation5 + $0x10] sm:$0xff]  ;;  %v265_v59 = vld [vmem:[#allocation5 + $0x28] sm:$0xff]  ;;  %v267_v60 = vld [vmem:[#allocation5 + $0x38] sm:$0xff] }
  0x33   :  { %2875 = vmatprep.subr.bf16.mxu0 %v3698_v20  ;;  %v3799_v61 = vpack.c.bf16 %v262_v58, %v260_v56  ;;  %v3801_v62 = vpack.c.bf16 %v267_v60, %v265_v59  ;;  %v264_v63 = vld [vmem:[#allocation5 + $0x20] sm:$0xff]  ;;  %v266_v0 = vld [vmem:[#allocation5 + $0x30] sm:$0xff]  ;;  %v269_v2 = vld [vmem:[#allocation5 + $0x48] sm:$0xff] }
  0x34   :  { %2883 = vmatprep.subr.bf16.mxu1 %v3797_v57  ;;  %v271_v3 = vld [vmem:[#allocation5 + $0x58] sm:$0xff]  ;;  %v3805_v4 = vpack.c.bf16 %v266_v0, %v264_v63  ;;  %v268_v6 = vld [vmem:[#allocation5 + $0x40] sm:$0xff]  ;;  %v270_v7 = vld [vmem:[#allocation5 + $0x50] sm:$0xff] }
  0x35   :  { %2753 = vmatmul.mubr.msk.f32.gmra.mrb[4].mxu0 %vm85_vm1, %v64_v25  ;;  %2885 = vmatpush1.bf16.msra.mxu1 %v3799_v61  ;;  %v3808_v5 = vpack.c.bf16 %v271_v3, %v269_v2  ;;  %v273_v8 = vld [vmem:[#allocation5 + $0x68] sm:$0xff]  ;;  %v275_v11 = vld [vmem:[#allocation5 + $0x78] sm:$0xff]  ;;  %v3811_v12 = vpack.c.bf16 %v270_v7, %v268_v6  ;;  %v272_v14 = vld [vmem:[#allocation5 + $0x60] sm:$0xff] }
  0x36   :  { %197 = vmatprep.mubr.f32.mxu0 %v3565_v1  ;;  %2877 = vmatpush1.bf16.msra.mxu0 %v3718_v26  ;;  %v3814_v13 = vpack.c.bf16 %v275_v11, %v273_v8  ;;  %v274_v16 = vld [vmem:[#allocation5 + $0x70] sm:$0xff]  ;;  %v245_v17 = vld [vmem:[#allocation3 + $0x8] sm:$0xff]  ;;  %v247_v18 = vld [vmem:[#allocation3 + $0x18] sm:$0xff] }
  0x37   :  { %2879 = vmatprep.subr.bf16.mxu0 %v3721_v27  ;;  %2887 = vmatprep.subr.bf16.mxu1 %v3801_v62  ;;  %v3817_v21 = vpack.c.bf16 %v274_v16, %v272_v14  ;;  %v3820_v22 = vpack.c.bf16 %v247_v18, %v245_v17  ;;  %v244_v23 = vld [vmem:[#allocation3] sm:$0xff]  ;;  %v246_v24 = vld [vmem:[#allocation3 + $0x10] sm:$0xff]  ;;  %v249_v25 = vld [vmem:[#allocation3 + $0x28] sm:$0xff] }
  0x38   :  { %v251_v28 = vld [vmem:[#allocation3 + $0x38] sm:$0xff]  ;;  %v3823_v29 = vpack.c.bf16 %v246_v24, %v244_v23 }
  0x39   :  { %2754 = vmatmul.mubr.msk.f32.gmra.mrb[6].mxu0 %vm85_vm1, %v65_v30  ;;  %2889 = vmatpush1.bf16.msra.mxu1 %v3805_v4  ;;  %v3826_v30 = vpack.c.bf16 %v251_v28, %v249_v25 }
  0x3a   :  { %203 = vmatprep.mubr.f32.mxu0 %v3565_v1  ;;  %2881 = vmatpush1.bf16.msra.mxu0 %v3735_v31 }
  0x3b   :  { %2915 = vmatprep.subr.bf16.mxu0 %v3664_v9  ;;  %2891 = vmatprep.subr.bf16.mxu1 %v3808_v5 }
  0x3d   :  { %2755 = vmatmul.mubr.msk.f32.gmra.mrb[8].mxu0 %vm85_vm1, %v66_v32  ;;  %2893 = vmatpush1.bf16.msra.mxu1 %v3811_v12  ;;  %v248_v32 = vld [vmem:[#allocation3 + $0x20] sm:$0xff] }
  0x3e   :  { %209 = vmatprep.mubr.f32.mxu0 %v3565_v1  ;;  %2895 = vmatprep.subr.bf16.mxu1 %v3814_v13 }
  0x41   :  { %2756 = vmatmul.mubr.msk.f32.gmra.mrb[10].mxu0 %vm85_vm1, %v67_v33  ;;  %2897 = vmatpush1.bf16.msra.mxu1 %v3817_v21  ;;  %v250_v33 = vld [vmem:[#allocation3 + $0x30] sm:$0xff] }
  0x42   :  { %215 = vmatprep.mubr.f32.mxu0 %v3565_v1  ;;  %2899 = vmatprep.subr.bf16.mxu1 %v3820_v22  ;;  %v3830_v36 = vpack.c.bf16 %v250_v33, %v248_v32 }
  0x44   :  { %450 = vmatmul.mubr.f32.vlgmr.msra.gmra.mrb[0].mxu1 %v3565_v1 }
  0x45   :  { %2757 = vmatmul.mubr.msk.f32.gmra.mrb[12].mxu0 %vm85_vm1, %v68_v34  ;;  %v253_v34 = vld [vmem:[#allocation3 + $0x48] sm:$0xff]  ;;  %2901 = vmatpush1.bf16.msra.mxu1 %v3823_v29 }
  0x46   :  { %221 = vmatprep.mubr.f32.mxu0 %v3565_v1  ;;  %523 = vmatprep.mubr.f32.mxu1 %v3565_v1 }
  0x47   :  { %2903 = vmatprep.subr.bf16.mxu1 %v3826_v30 }
  0x49   :  { %2758 = vmatmul.mubr.msk.f32.gmra.mrb[14].mxu0 %vm85_vm1, %v69_v35  ;;  %v255_v35 = vld [vmem:[#allocation3 + $0x58] sm:$0xff]  ;;  %2905 = vmatpush1.bf16.msra.mxu1 %v3830_v36 }
  0x4a   :  { %345 = vmatprep.mubr.f32.mxu0 %v3565_v1  ;;  %v3834_v39 = vpack.c.bf16 %v255_v35, %v253_v34 }
  0x4c   :  { %2907 = vmatprep.subr.bf16.mxu1 %v3834_v39 }
  0x4d   :  { %346 = vmatmul.mubr.f32.vlgmr.msra.gmra.mrb[0].mxu0 %v3565_v1 }
  0x4e   :  { %2917 = vmatpush1.bf16.msra.mxu0 %v3666_v10  ;;  %641 = vmatprep.mubr.f32.mxu0 %v3565_v1 }
  0x4f   :  { %2919 = vmatprep.subr.bf16.mxu0 %v3680_v15 }
  0x52   :  { %2921 = vmatpush1.bf16.msra.mxu0 %v3695_v19 }
  0x53   :  { %2923 = vmatprep.subr.bf16.mxu0 %v3698_v20 }
  0x56   :  { %2925 = vmatpush1.bf16.msra.mxu0 %v3718_v26 }
  0x57   :  { %2927 = vmatprep.subr.bf16.mxu0 %v3721_v27 }
  0x5a   :  { %2929 = vmatpush1.bf16.msra.mxu0 %v3735_v31 }
  0x5b   :  { %2963 = vmatprep.subr.bf16.mxu0 %v3664_v9 }
 0x120   :  { %v347_v41 = vpop.f32.mrb[0].mxu0 }
 0x121   :  { %v349_v42 = vpop.f32.mrb[1].mxu0  ;;  %v3266_v47 = vadd.f32 %v347_v41, %v3790_v46  ;;  %v252_v41 = vld [vmem:[#allocation3 + $0x40] sm:$0xff] }
 0x122   :  { %v3783_v43 = vadd.f32 %v349_v42, %v3780_v40  ;;  %v254_v42 = vld [vmem:[#allocation3 + $0x50] sm:$0xff] }
 0x123   :  { %v2759_v48 = vmul.f32 -1.442695, %v3266_v47  ;;  %v257_v47 = vld [vmem:[#allocation3 + $0x68] sm:$0xff] }
 0x124   :  { %3321 = vtanh.f32 %v3783_v43 }
 0x125   :  { %3323 = vpow2.f32 %v2759_v48  ;;  %v259_v48 = vld [vmem:[#allocation3 + $0x78] sm:$0xff] }
 0x12e   :  { %v3322_v44 = vpop.eup %3321 }
 0x12f   :  { %369 = vrot.lane.b32.xlu0 %v3322_v44, %s3566_s14  ;;  %v3324_v49 = vpop.eup %3323  ;;  %v3837_v44 = vpack.c.bf16 %v254_v42, %v252_v41 }
 0x130   :  { %v360_v50 = vadd.f32 1.0, %v3324_v49 }
 0x131   :  { %2909 = vmatpush1.bf16.msra.mxu1 %v3837_v44 }
 0x132   :  { %3325 = vrcp.f32 %v360_v50  ;;  %v3842_v50 = vpack.c.bf16 %v259_v48, %v257_v47 }
 0x134   :  { %2911 = vmatprep.subr.bf16.mxu1 %v3842_v50 }
 0x13c   :  { %v3793_v51 = vpop.eup %3325 }
 0x13d   :  { %v367_v49 = vmul.f32 0.0, %v3793_v51 }
 0x1a1   :  { %v370_v52 = vpop.permute.xlu0 %369 }
 0x1a2   :  { %v372_v53 = vmul.f32 %v3793_v51, %v370_v52  ;;  %v256_v52 = vld [vmem:[#allocation3 + $0x60] sm:$0xff]  ;;  %v2760_v51 = vmul.f32 -1.442695, %v3783_v43 }
 0x1a3   :  { %v276_v43 = vld [vmem:[%s4293_s6] sm:$0x3] }
 0x1a4   :  { %374 = vrot.lane.b32.xlu0 %v372_v53, %s3566_s14  ;;  %v258_v53 = vld [vmem:[#allocation3 + $0x70] sm:$0xff]  ;;  %v3879_v8 = vrot.slane %v276_v43, %v79_v38  ;;  %v3888_v38 = vrot.slane %v276_v43, %v75_v45 }
 0x1a5   :  { %v3844_v55 = vpack.c.bf16 %v258_v53, %v256_v52 }
 0x1a7   :  { %2913 = vmatpush1.bf16.msra.mxu1 %v3844_v55 }
 0x1a8   :  { %2931 = vmatprep.subr.bf16.mxu1 %v3797_v57 }
 0x216   :  { %v375_v54 = vpop.permute.xlu0 %374 }
 0x217   :  { %v3846_v56 = vadd.f32 %v375_v54, %v367_v49 }
 0x219   :  { %3327 = vtanh.f32 %v3846_v56 }
 0x21a   :  { %3329 = vpow2.f32 %v2760_v51 }
 0x223   :  { %v3328_v58 = vpop.eup %3327 }
 0x224   :  { %380 = vrot.lane.b32.xlu1 %v3328_v58, %s3566_s14  ;;  %v3330_v59 = vpop.eup %3329 }
 0x225   :  { %v361_v60 = vadd.f32 1.0, %v3330_v59 }
 0x227   :  { %3331 = vrcp.f32 %v361_v60 }
 0x231   :  { %v3332_v63 = vpop.eup %3331 }
 0x296   :  { %v381_v0 = vpop.permute.xlu1 %380 }
 0x297   :  { %v383_v2 = vmul.f32 %v3332_v63, %v381_v0 }
 0x299   :  { %v384_v3 = vmax.f32 %v383_v2, 0.0  ;;  %2764 = vmatmul.mubr.msk.f32.vlgmr.msra.gmra.mrb[2].mxu0 %vm277_vm2, %v383_v2 }
 0x29a   :  { %2965 = vmatpush1.bf16.msra.mxu0 %v3666_v10  ;;  %929 = vmatprep.mubr.f32.mxu0 %v3565_v1 }
 0x29b   :  { %2761 = vmatmul.mubr.msk.f32.vlgmr.msra.gmra.mrb[0].mxu1 %vm277_vm2, %v384_v3  ;;  %2967 = vmatprep.subr.bf16.mxu0 %v3680_v15 }
 0x29c   :  { %2933 = vmatpush1.bf16.msra.mxu1 %v3799_v61  ;;  %748 = vmatprep.mubr.f32.mxu1 %v3565_v1 }
 0x29d   :  { %2935 = vmatprep.subr.bf16.mxu1 %v3801_v62 }
 0x29e   :  { %2969 = vmatpush1.bf16.msra.mxu0 %v3695_v19 }
 0x29f   :  { %2971 = vmatprep.subr.bf16.mxu0 %v3698_v20 }
 0x2a0   :  { %2937 = vmatpush1.bf16.msra.mxu1 %v3805_v4 }
 0x2a1   :  { %2939 = vmatprep.subr.bf16.mxu1 %v3808_v5 }
 0x2a2   :  { %2973 = vmatpush1.bf16.msra.mxu0 %v3718_v26 }
 0x2a3   :  { %2975 = vmatprep.subr.bf16.mxu0 %v3721_v27 }
 0x2a4   :  { %2941 = vmatpush1.bf16.msra.mxu1 %v3811_v12 }
 0x2a5   :  { %2943 = vmatprep.subr.bf16.mxu1 %v3814_v13 }
 0x2a6   :  { %2977 = vmatpush1.bf16.msra.mxu0 %v3735_v31 }
 0x2a7   :  { %3011 = vmatprep.subr.bf16.mxu0 %v3664_v9 }
 0x2a8   :  { %2945 = vmatpush1.bf16.msra.mxu1 %v3817_v21 }
 0x2a9   :  { %2947 = vmatprep.subr.bf16.mxu1 %v3820_v22 }
 0x36c   :  { %v643_v6 = vpop.f32.mrb[2].mxu0 }
 0x36d   :  { %v645_v7 = vpop.f32.mrb[3].mxu0  ;;  %v3268_v24 = vadd.f32 %v643_v6, %v3790_v46 }
 0x36e   :  { %v3269_v11 = vadd.f32 %v645_v7, %v3780_v40  ;;  %v525_v14 = vpop.f32.mrb[0].mxu1 }
 0x36f   :  { %v527_v16 = vpop.f32.mrb[1].mxu1  ;;  %v2765_v25 = vmul.f32 -1.442695, %v3268_v24  ;;  %v541_v28 = vadd.f32 %v3888_v38, %v525_v14 }
 0x370   :  { %3333 = vtanh.f32 %v3269_v11  ;;  %v542_v17 = vadd.f32 %v3879_v8, %v527_v16  ;;  %v2766_v0 = vmul.f32 -1.442695, %v3269_v11 }
 0x371   :  { %v2762_v32 = vmul.f32 -1.442695, %v541_v28 }
 0x372   :  { %3335 = vtanh.f32 %v542_v17 }
 0x373   :  { %3337 = vpow2.f32 %v2765_v25 }
 0x374   :  { %3339 = vpow2.f32 %v2762_v32 }
 0x37a   :  { %v3334_v18 = vpop.eup %3333 }
 0x37b   :  { %665 = vrot.lane.b32.xlu0 %v3334_v18, %s3566_s14 }
 0x37c   :  { %v3336_v23 = vpop.eup %3335 }
 0x37d   :  { %558 = vrot.lane.b32.xlu1 %v3336_v23, %s3566_s14  ;;  %v3338_v33 = vpop.eup %3337 }
 0x37e   :  { %v656_v34 = vadd.f32 1.0, %v3338_v33  ;;  %v3340_v35 = vpop.eup %3339 }
 0x37f   :  { %v549_v41 = vadd.f32 1.0, %v3340_v35 }
 0x380   :  { %3341 = vrcp.f32 %v656_v34 }
 0x381   :  { %3343 = vrcp.f32 %v549_v41 }
 0x38a   :  { %v3342_v42 = vpop.eup %3341 }
 0x38b   :  { %v3344_v37 = vpop.eup %3343  ;;  %v663_v52 = vmul.f32 %v3342_v42, %v3846_v56  ;;  %v2763_v56 = vmul.f32 -1.442695, %v542_v17 }
 0x38c   :  { %v556_v58 = vmul.f32 0.0, %v3344_v37 }
 0x3ed   :  { %v666_v47 = vpop.permute.xlu0 %665 }
 0x3ee   :  { %v668_v48 = vmul.f32 %v3342_v42, %v666_v47 }
 0x3ef   :  { %v559_v45 = vpop.permute.xlu1 %558 }
 0x3f0   :  { %670 = vrot.lane.b32.xlu0 %v668_v48, %s3566_s14  ;;  %v561_v49 = vmul.f32 %v3344_v37, %v559_v45 }
 0x3f2   :  { %563 = vrot.lane.b32.xlu1 %v561_v49, %s3566_s14 }
 0x462   :  { %v671_v53 = vpop.permute.xlu0 %670 }
 0x463   :  { %v3894_v54 = vadd.f32 %v671_v53, %v663_v52 }
 0x464   :  { %v564_v51 = vpop.permute.xlu1 %563 }
 0x465   :  { %3345 = vtanh.f32 %v3894_v54  ;;  %v3897_v59 = vadd.f32 %v564_v51, %v556_v58 }
 0x467   :  { %3347 = vtanh.f32 %v3897_v59 }
 0x468   :  { %3349 = vpow2.f32 %v2766_v0 }
 0x469   :  { %3351 = vpow2.f32 %v2763_v56 }
 0x46f   :  { %v3346_v60 = vpop.eup %3345 }
 0x470   :  { %676 = vrot.lane.b32.xlu0 %v3346_v60, %s3566_s14 }
 0x471   :  { %v3348_v63 = vpop.eup %3347 }
 0x472   :  { %569 = vrot.lane.b32.xlu1 %v3348_v63, %s3566_s14  ;;  %v3350_v2 = vpop.eup %3349 }
 0x473   :  { %v657_v3 = vadd.f32 1.0, %v3350_v2  ;;  %v3352_v43 = vpop.eup %3351 }
 0x474   :  { %v550_v6 = vadd.f32 1.0, %v3352_v43 }
 0x475   :  { %3353 = vrcp.f32 %v657_v3 }
 0x476   :  { %3355 = vrcp.f32 %v550_v6 }
 0x47f   :  { %v3354_v7 = vpop.eup %3353 }
 0x480   :  { %v3356_v18 = vpop.eup %3355 }
 0x4e2   :  { %v677_v14 = vpop.permute.xlu0 %676 }
 0x4e3   :  { %v679_v16 = vmul.f32 %v3354_v7, %v677_v14 }
 0x4e4   :  { %v570_v11 = vpop.permute.xlu1 %569 }
 0x4e5   :  { %2771 = vmatmul.mubr.msk.f32.vlgmr.msra.gmra.mrb[4].mxu0 %vm277_vm2, %v679_v16  ;;  %v3906_v17 = vmul.f32 %v3356_v18, %v570_v11  ;;  %v680_v23 = vmax.f32 %v679_v16, 0.0 }
 0x4e6   :  { %3013 = vmatpush1.bf16.msra.mxu0 %v3666_v10  ;;  %1217 = vmatprep.mubr.f32.mxu0 %v3565_v1 }
 0x4e7   :  { %3015 = vmatprep.subr.bf16.mxu0 %v3680_v15  ;;  %2767 = vmatmul.mubr.msk.f32.vlgmr.msra.gmra.mrb[2].mxu1 %vm277_vm2, %v3906_v17 }
 0x4e8   :  { %2949 = vmatpush1.bf16.msra.mxu1 %v3823_v29  ;;  %822 = vmatprep.mubr.f32.mxu1 %v3565_v1 }
 0x4e9   :  { %2951 = vmatprep.subr.bf16.mxu1 %v3826_v30 }
 0x4ea   :  { %3017 = vmatpush1.bf16.msra.mxu0 %v3695_v19 }
 0x4eb   :  { %3019 = vmatprep.subr.bf16.mxu0 %v3698_v20 }
 0x4ec   :  { %2953 = vmatpush1.bf16.msra.mxu1 %v3830_v36 }
 0x4ed   :  { %2955 = vmatprep.subr.bf16.mxu1 %v3834_v39 }
 0x4ee   :  { %3021 = vmatpush1.bf16.msra.mxu0 %v3718_v26 }
 0x4ef   :  { %3023 = vmatprep.subr.bf16.mxu0 %v3721_v27 }
 0x4f0   :  { %2957 = vmatpush1.bf16.msra.mxu1 %v3837_v44 }
 0x4f1   :  { %2959 = vmatprep.subr.bf16.mxu1 %v3842_v50 }
 0x4f2   :  { %3025 = vmatpush1.bf16.msra.mxu0 %v3735_v31 }
 0x4f3   :  { %3027 = vmatprep.subr.bf16.mxu0 %v3797_v57 }
 0x4f4   :  { %2961 = vmatpush1.bf16.msra.mxu1 %v3844_v55 }
 0x4f5   :  { %2979 = vmatprep.subr.bf16.mxu1 %v3797_v57 }
 0x4f7   :  { %2768 = vmatmul.mubr.msk.f32.vlgmr.msra.gmra.mrb[2].mxu1 %vm277_vm2, %v680_v23 }
 0x4f8   :  { %2981 = vmatpush1.bf16.msra.mxu1 %v3799_v61  ;;  %1036 = vmatprep.mubr.f32.mxu1 %v3565_v1 }
 0x4f9   :  { %2983 = vmatprep.subr.bf16.mxu1 %v3801_v62 }
 0x4fc   :  { %2985 = vmatpush1.bf16.msra.mxu1 %v3805_v4 }
 0x4fd   :  { %2987 = vmatprep.subr.bf16.mxu1 %v3808_v5 }
 0x500   :  { %2989 = vmatpush1.bf16.msra.mxu1 %v3811_v12 }
 0x501   :  { %2991 = vmatprep.subr.bf16.mxu1 %v3814_v13 }
 0x504   :  { %2993 = vmatpush1.bf16.msra.mxu1 %v3817_v21 }
 0x505   :  { %2995 = vmatprep.subr.bf16.mxu1 %v3820_v22 }
 0x5b8   :  { %v931_v24 = vpop.f32.mrb[4].mxu0 }
 0x5b9   :  { %v933_v25 = vpop.f32.mrb[5].mxu0  ;;  %v3270_v42 = vadd.f32 %v931_v24, %v3790_v46 }
 0x5ba   :  { %v3271_v28 = vadd.f32 %v933_v25, %v3780_v40 }
 0x5bb   :  { %v2772_v47 = vmul.f32 -1.442695, %v3270_v42 }
 0x5bc   :  { %3357 = vtanh.f32 %v3271_v28  ;;  %v2773_v11 = vmul.f32 -1.442695, %v3271_v28 }
 0x5c6   :  { %v3358_v32 = vpop.eup %3357 }
 0x5c7   :  { %953 = vrot.lane.b32.xlu0 %v3358_v32, %s3566_s14 }
 0x5ca   :  { %v824_v33 = vpop.f32.mrb[2].mxu1 }
 0x5cb   :  { %v826_v34 = vpop.f32.mrb[3].mxu1  ;;  %v829_v45 = vadd.f32 %v824_v33, %v3888_v38 }
 0x5cc   :  { %v830_v35 = vadd.f32 %v826_v34, %v3879_v8 }
 0x5cd   :  { %v2769_v49 = vmul.f32 -1.442695, %v829_v45 }
 0x5ce   :  { %3359 = vtanh.f32 %v830_v35  ;;  %v2770_v24 = vmul.f32 -1.442695, %v830_v35 }
 0x5cf   :  { %3361 = vpow2.f32 %v2772_v47 }
 0x5d8   :  { %v3360_v41 = vpop.eup %3359 }
 0x5d9   :  { %846 = vrot.lane.b32.xlu1 %v3360_v41, %s3566_s14  ;;  %v3362_v48 = vpop.eup %3361 }
 0x5da   :  { %v944_v37 = vadd.f32 1.0, %v3362_v48 }
 0x5dc   :  { %3363 = vrcp.f32 %v944_v37 }
 0x5dd   :  { %3365 = vpow2.f32 %v2769_v49 }
 0x5e6   :  { %v3364_v52 = vpop.eup %3363 }
 0x5e7   :  { %v3366_v51 = vpop.eup %3365  ;;  %v951_v2 = vmul.f32 %v3364_v52, %v3894_v54 }
 0x5e8   :  { %v837_v60 = vadd.f32 1.0, %v3366_v51 }
 0x5ea   :  { %3367 = vrcp.f32 %v837_v60 }
 0x5f4   :  { %v3368_v63 = vpop.eup %3367 }
 0x5f5   :  { %v844_v7 = vmul.f32 %v3368_v63, %v3897_v59 }
 0x639   :  { %v954_v53 = vpop.permute.xlu0 %953 }
 0x63a   :  { %v956_v58 = vmul.f32 %v3364_v52, %v954_v53 }
 0x63c   :  { %958 = vrot.lane.b32.xlu0 %v956_v58, %s3566_s14 }
 0x64b   :  { %v847_v0 = vpop.permute.xlu1 %846 }
 0x64c   :  { %v849_v56 = vmul.f32 %v3368_v63, %v847_v0 }
 0x64e   :  { %851 = vrot.lane.b32.xlu1 %v849_v56, %s3566_s14 }
 0x6ae   :  { %v959_v3 = vpop.permute.xlu0 %958 }
 0x6af   :  { %v3944_v43 = vadd.f32 %v959_v3, %v951_v2 }
 0x6b1   :  { %3369 = vtanh.f32 %v3944_v43 }
 0x6bb   :  { %v3370_v6 = vpop.eup %3369 }
 0x6bc   :  { %964 = vrot.lane.b32.xlu0 %v3370_v6, %s3566_s14 }
 0x6c0   :  { %v852_v14 = vpop.permute.xlu1 %851 }
 0x6c1   :  { %v3949_v16 = vadd.f32 %v852_v14, %v844_v7 }
 0x6c3   :  { %3371 = vtanh.f32 %v3949_v16 }
 0x6c4   :  { %3373 = vpow2.f32 %v2773_v11 }
 0x6cd   :  { %v3372_v18 = vpop.eup %3371 }
 0x6ce   :  { %857 = vrot.lane.b32.xlu1 %v3372_v18, %s3566_s14  ;;  %v3374_v54 = vpop.eup %3373 }
 0x6cf   :  { %v945_v23 = vadd.f32 1.0, %v3374_v54 }
 0x6d1   :  { %3375 = vrcp.f32 %v945_v23 }
 0x6d2   :  { %3377 = vpow2.f32 %v2770_v24 }
 0x6db   :  { %v3376_v25 = vpop.eup %3375 }
 0x6dc   :  { %v3378_v59 = vpop.eup %3377 }
 0x6dd   :  { %v838_v34 = vadd.f32 1.0, %v3378_v59 }
 0x6df   :  { %3379 = vrcp.f32 %v838_v34 }
 0x6e9   :  { %v3380_v28 = vpop.eup %3379 }
 0x72e   :  { %v965_v32 = vpop.permute.xlu0 %964 }
 0x72f   :  { %v967_v33 = vmul.f32 %v3376_v25, %v965_v32 }
 0x731   :  { %2778 = vmatmul.mubr.msk.f32.vlgmr.msra.gmra.mrb[6].mxu0 %vm277_vm2, %v967_v33  ;;  %v968_v42 = vmax.f32 %v967_v33, 0.0 }
 0x732   :  { %3029 = vmatpush1.bf16.msra.mxu0 %v3799_v61  ;;  %1324 = vmatprep.mubr.f32.mxu0 %v3565_v1 }
 0x733   :  { %3031 = vmatprep.subr.bf16.mxu0 %v3801_v62 }
 0x736   :  { %3033 = vmatpush1.bf16.msra.mxu0 %v3805_v4 }
 0x737   :  { %3035 = vmatprep.subr.bf16.mxu0 %v3808_v5 }
 0x73a   :  { %3037 = vmatpush1.bf16.msra.mxu0 %v3811_v12 }
 0x73b   :  { %3039 = vmatprep.subr.bf16.mxu0 %v3814_v13 }
 0x73e   :  { %3041 = vmatpush1.bf16.msra.mxu0 %v3817_v21 }
 0x73f   :  { %3043 = vmatprep.subr.bf16.mxu0 %v3820_v22 }
 0x740   :  { %v858_v35 = vpop.permute.xlu1 %857 }
 0x741   :  { %v3963_v41 = vmul.f32 %v3380_v28, %v858_v35 }
 0x743   :  { %2774 = vmatmul.mubr.msk.f32.vlgmr.msra.gmra.mrb[4].mxu1 %vm277_vm2, %v3963_v41 }
 0x744   :  { %2997 = vmatpush1.bf16.msra.mxu1 %v3823_v29  ;;  %1110 = vmatprep.mubr.f32.mxu1 %v3565_v1 }
 0x745   :  { %2999 = vmatprep.subr.bf16.mxu1 %v3826_v30 }
 0x748   :  { %3001 = vmatpush1.bf16.msra.mxu1 %v3830_v36 }
 0x749   :  { %3003 = vmatprep.subr.bf16.mxu1 %v3834_v39 }
 0x74c   :  { %3005 = vmatpush1.bf16.msra.mxu1 %v3837_v44 }
 0x74d   :  { %3007 = vmatprep.subr.bf16.mxu1 %v3842_v50 }
 0x750   :  { %3009 = vmatpush1.bf16.msra.mxu1 %v3844_v55 }
 0x751   :  { %3075 = vmatprep.subr.bf16.mxu1 %v3797_v57 }
 0x753   :  { %2775 = vmatmul.mubr.msk.f32.vlgmr.msra.gmra.mrb[4].mxu1 %vm277_vm2, %v968_v42 }
 0x754   :  { %3077 = vmatpush1.bf16.msra.mxu1 %v3799_v61  ;;  %1612 = vmatprep.mubr.f32.mxu1 %v3565_v1 }
 0x755   :  { %3079 = vmatprep.subr.bf16.mxu1 %v3801_v62 }
 0x758   :  { %3081 = vmatpush1.bf16.msra.mxu1 %v3805_v4 }
 0x759   :  { %3083 = vmatprep.subr.bf16.mxu1 %v3808_v5 }
 0x75c   :  { %3085 = vmatpush1.bf16.msra.mxu1 %v3811_v12 }
 0x75d   :  { %3087 = vmatprep.subr.bf16.mxu1 %v3814_v13 }
 0x760   :  { %3089 = vmatpush1.bf16.msra.mxu1 %v3817_v21 }
 0x761   :  { %3091 = vmatprep.subr.bf16.mxu1 %v3820_v22 }
 0x804   :  { %v1219_v47 = vpop.f32.mrb[6].mxu0 }
 0x805   :  { %v1221_v48 = vpop.f32.mrb[7].mxu0  ;;  %v3272_v51 = vadd.f32 %v1219_v47, %v3790_v46 }
 0x806   :  { %v3273_v37 = vadd.f32 %v1221_v48, %v3780_v40 }
 0x807   :  { %v2779_v60 = vmul.f32 -1.442695, %v3272_v51 }
 0x808   :  { %3381 = vtanh.f32 %v3273_v37 }
 0x812   :  { %v3382_v45 = vpop.eup %3381 }
 0x813   :  { %1241 = vrot.lane.b32.xlu0 %v3382_v45, %s3566_s14 }
 0x826   :  { %v1112_v49 = vpop.f32.mrb[4].mxu1 }
 0x827   :  { %v1114_v52 = vpop.f32.mrb[5].mxu1  ;;  %v1117_v6 = vadd.f32 %v1112_v49, %v3888_v38 }
 0x828   :  { %v1118_v53 = vadd.f32 %v1114_v52, %v3879_v8 }
 0x829   :  { %v2776_v7 = vmul.f32 -1.442695, %v1117_v6 }
 0x82a   :  { %3383 = vtanh.f32 %v1118_v53  ;;  %v2777_v42 = vmul.f32 -1.442695, %v1118_v53 }
 0x82b   :  { %3385 = vpow2.f32 %v2779_v60 }
 0x834   :  { %v3384_v58 = vpop.eup %3383 }
 0x835   :  { %1134 = vrot.lane.b32.xlu1 %v3384_v58, %s3566_s14  ;;  %v3386_v63 = vpop.eup %3385 }
 0x836   :  { %v1232_v0 = vadd.f32 1.0, %v3386_v63 }
 0x838   :  { %3387 = vrcp.f32 %v1232_v0 }
 0x839   :  { %3389 = vpow2.f32 %v2776_v7 }
 0x842   :  { %v3388_v56 = vpop.eup %3387 }
 0x843   :  { %v3390_v14 = vpop.eup %3389  ;;  %v1239_v24 = vmul.f32 %v3388_v56, %v3944_v43  ;;  %v2780_v43 = vmul.f32 -1.442695, %v3273_v37 }
 0x844   :  { %v1125_v18 = vadd.f32 1.0, %v3390_v14 }
 0x846   :  { %3391 = vrcp.f32 %v1125_v18 }
 0x850   :  { %v3392_v11 = vpop.eup %3391 }
 0x851   :  { %v1132_v59 = vmul.f32 %v3392_v11, %v3949_v16 }
 0x885   :  { %v1242_v2 = vpop.permute.xlu0 %1241 }
 0x886   :  { %v1244_v3 = vmul.f32 %v3388_v56, %v1242_v2 }
 0x888   :  { %1246 = vrot.lane.b32.xlu0 %v1244_v3, %s3566_s14 }
 0x8a7   :  { %v1135_v54 = vpop.permute.xlu1 %1134 }
 0x8a8   :  { %v1137_v23 = vmul.f32 %v3392_v11, %v1135_v54 }
 0x8aa   :  { %1139 = vrot.lane.b32.xlu1 %v1137_v23, %s3566_s14 }
 0x8fa   :  { %v1247_v25 = vpop.permute.xlu0 %1246 }
 0x8fb   :  { %v3995_v32 = vadd.f32 %v1247_v25, %v1239_v24 }
 0x8fd   :  { %3393 = vtanh.f32 %v3995_v32 }
 0x907   :  { %v3394_v33 = vpop.eup %3393 }
 0x908   :  { %1252 = vrot.lane.b32.xlu0 %v3394_v33, %s3566_s14 }
 0x91c   :  { %v1140_v34 = vpop.permute.xlu1 %1139 }
 0x91d   :  { %v4000_v28 = vadd.f32 %v1140_v34, %v1132_v59 }
 0x91f   :  { %3395 = vtanh.f32 %v4000_v28 }
 0x920   :  { %3397 = vpow2.f32 %v2777_v42 }
 0x921   :  { %3399 = vpow2.f32 %v2780_v43 }
 0x929   :  { %v3396_v35 = vpop.eup %3395 }
 0x92a   :  { %1145 = vrot.lane.b32.xlu1 %v3396_v35, %s3566_s14  ;;  %v3398_v47 = vpop.eup %3397 }
 0x92b   :  { %v1126_v48 = vadd.f32 1.0, %v3398_v47  ;;  %v3400_v45 = vpop.eup %3399 }
 0x92c   :  { %v1233_v49 = vadd.f32 1.0, %v3400_v45 }
 0x92d   :  { %3401 = vrcp.f32 %v1126_v48 }
 0x92e   :  { %3403 = vrcp.f32 %v1233_v49 }
 0x937   :  { %v3402_v52 = vpop.eup %3401 }
 0x938   :  { %v3404_v53 = vpop.eup %3403 }
 0x97a   :  { %v1253_v37 = vpop.permute.xlu0 %1252 }
 0x97b   :  { %v1255_v51 = vmul.f32 %v3404_v53, %v1253_v37 }
 0x97d   :  { %v1256_v60 = vmax.f32 %v1255_v51, 0.0 }
 0x99c   :  { %v1146_v58 = vpop.permute.xlu1 %1145 }
 0x99d   :  { %v4004_v16 = vmul.f32 %v3402_v52, %v1146_v58 }
 0x99f   :  { %2781 = vmatmul.mubr.msk.f32.vlgmr.msra.gmra.mrb[16].mxu0 %vm277_vm2, %v4004_v16 }
 0x9a0   :  { %3045 = vmatpush1.bf16.msra.mxu0 %v3823_v29  ;;  %1398 = vmatprep.mubr.f32.mxu0 %v3565_v1 }
 0x9a1   :  { %3047 = vmatprep.subr.bf16.mxu0 %v3826_v30 }
 0x9a4   :  { %3049 = vmatpush1.bf16.msra.mxu0 %v3830_v36 }
 0x9a5   :  { %3051 = vmatprep.subr.bf16.mxu0 %v3834_v39 }
 0x9a8   :  { %3053 = vmatpush1.bf16.msra.mxu0 %v3837_v44 }
 0x9a9   :  { %3055 = vmatprep.subr.bf16.mxu0 %v3842_v50 }
 0x9ac   :  { %3057 = vmatpush1.bf16.msra.mxu0 %v3844_v55 }
 0x9ad   :  { %3059 = vmatprep.subr.bf16.mxu0 %v3664_v9 }
 0x9af   :  { %2782 = vmatmul.mubr.msk.f32.vlgmr.msra.gmra.mrb[16].mxu0 %vm277_vm2, %v1256_v60 }
 0x9b0   :  { %3061 = vmatpush1.bf16.msra.mxu0 %v3666_v10  ;;  %1505 = vmatprep.mubr.f32.mxu0 %v3565_v1 }
 0x9b1   :  { %3063 = vmatprep.subr.bf16.mxu0 %v3680_v15 }
 0x9b4   :  { %3065 = vmatpush1.bf16.msra.mxu0 %v3695_v19 }
 0x9b5   :  { %3067 = vmatprep.subr.bf16.mxu0 %v3698_v20 }
 0x9b8   :  { %3069 = vmatpush1.bf16.msra.mxu0 %v3718_v26 }
 0x9b9   :  { %3071 = vmatprep.subr.bf16.mxu0 %v3721_v27 }
 0x9bc   :  { %3073 = vmatpush1.bf16.msra.mxu0 %v3735_v31 }
 0x9bd   :  { %3107 = vmatprep.subr.bf16.mxu0 %v3664_v9 }
 0x9bf   :  { %2785 = vmatmul.mubr.msk.f32.vlgmr.msra.gmra.mrb[8].mxu0 %vm277_vm2, %v1255_v51 }
 0x9c0   :  { %3109 = vmatpush1.bf16.msra.mxu0 %v3666_v10  ;;  %1793 = vmatprep.mubr.f32.mxu0 %v3565_v1 }
 0x9c1   :  { %3111 = vmatprep.subr.bf16.mxu0 %v3680_v15 }
 0x9c4   :  { %3113 = vmatpush1.bf16.msra.mxu0 %v3695_v19 }
 0x9c5   :  { %3115 = vmatprep.subr.bf16.mxu0 %v3698_v20 }
 0x9c8   :  { %3117 = vmatpush1.bf16.msra.mxu0 %v3718_v26 }
 0x9c9   :  { %3119 = vmatprep.subr.bf16.mxu0 %v3721_v27 }
 0x9cc   :  { %3121 = vmatpush1.bf16.msra.mxu0 %v3735_v31 }
 0x9cd   :  { %3155 = vmatprep.subr.bf16.mxu0 %v3664_v9 }
 0xa82   :  { %v1400_v63 = vpop.f32.mrb[16].mxu0 }
 0xa83   :  { %v1402_v0 = vpop.f32.mrb[17].mxu0  ;;  %v1405_v18 = vadd.f32 %v1400_v63, %v3888_v38 }
 0xa84   :  { %v1406_v56 = vadd.f32 %v1402_v0, %v3879_v8 }
 0xa85   :  { %v2783_v11 = vmul.f32 -1.442695, %v1405_v18 }
 0xa86   :  { %3405 = vtanh.f32 %v1406_v56  ;;  %v2784_v63 = vmul.f32 -1.442695, %v1406_v56 }
 0xa90   :  { %v3406_v2 = vpop.eup %3405 }
 0xa91   :  { %1422 = vrot.lane.b32.xlu1 %v3406_v2, %s3566_s14 }
 0xa92   :  { %v1507_v3 = vpop.f32.mrb[8].mxu0 }
 0xa93   :  { %v1509_v6 = vpop.f32.mrb[9].mxu0  ;;  %v3274_v54 = vadd.f32 %v1507_v3, %v3790_v46 }
 0xa94   :  { %v3275_v7 = vadd.f32 %v1509_v6, %v3780_v40 }
 0xa95   :  { %v2786_v24 = vmul.f32 -1.442695, %v3274_v54 }
 0xa96   :  { %3407 = vtanh.f32 %v3275_v7  ;;  %v2787_v0 = vmul.f32 -1.442695, %v3275_v7 }
 0xa97   :  { %3409 = vpow2.f32 %v2783_v11 }
 0xa98   :  { %3411 = vpow2.f32 %v2786_v24 }
 0xaa0   :  { %v3408_v14 = vpop.eup %3407 }
 0xaa1   :  { %1529 = vrot.lane.b32.xlu0 %v3408_v14, %s3566_s14  ;;  %v3410_v23 = vpop.eup %3409 }
 0xaa2   :  { %v1413_v25 = vadd.f32 1.0, %v3410_v23  ;;  %v3412_v33 = vpop.eup %3411 }
 0xaa3   :  { %v1520_v42 = vadd.f32 1.0, %v3412_v33 }
 0xaa4   :  { %3413 = vrcp.f32 %v1413_v25 }
 0xaa5   :  { %3415 = vrcp.f32 %v1520_v42 }
 0xaae   :  { %v3414_v59 = vpop.eup %3413 }
 0xaaf   :  { %v3416_v43 = vpop.eup %3415  ;;  %v1420_v45 = vmul.f32 %v3414_v59, %v4000_v28 }
 0xab0   :  { %v1527_v37 = vmul.f32 %v3416_v43, %v3995_v32 }
 0xb03   :  { %v1423_v34 = vpop.permute.xlu1 %1422 }
 0xb04   :  { %v1425_v35 = vmul.f32 %v3414_v59, %v1423_v34 }
 0xb06   :  { %1427 = vrot.lane.b32.xlu1 %v1425_v35, %s3566_s14 }
 0xb13   :  { %v1530_v47 = vpop.permute.xlu0 %1529 }
 0xb14   :  { %v1532_v48 = vmul.f32 %v3416_v43, %v1530_v47 }
 0xb16   :  { %1534 = vrot.lane.b32.xlu0 %v1532_v48, %s3566_s14 }
 0xb78   :  { %v1428_v49 = vpop.permute.xlu1 %1427 }
 0xb79   :  { %v4046_v52 = vadd.f32 %v1428_v49, %v1420_v45 }
 0xb7b   :  { %3417 = vtanh.f32 %v4046_v52 }
 0xb85   :  { %v3418_v58 = vpop.eup %3417 }
 0xb86   :  { %1433 = vrot.lane.b32.xlu1 %v3418_v58, %s3566_s14 }
 0xb88   :  { %v1535_v53 = vpop.permute.xlu0 %1534 }
 0xb89   :  { %v4051_v51 = vadd.f32 %v1535_v53, %v1527_v37 }
 0xb8b   :  { %3419 = vtanh.f32 %v4051_v51 }
 0xb8c   :  { %3421 = vpow2.f32 %v2784_v63 }
 0xb8d   :  { %3423 = vpow2.f32 %v2787_v0 }
 0xb95   :  { %v3420_v60 = vpop.eup %3419 }
 0xb96   :  { %1540 = vrot.lane.b32.xlu0 %v3420_v60, %s3566_s14  ;;  %v3422_v28 = vpop.eup %3421 }
 0xb97   :  { %v1414_v2 = vadd.f32 1.0, %v3422_v28  ;;  %v3424_v3 = vpop.eup %3423 }
 0xb98   :  { %v1521_v32 = vadd.f32 1.0, %v3424_v3 }
 0xb99   :  { %3425 = vrcp.f32 %v1414_v2 }
 0xb9a   :  { %3427 = vrcp.f32 %v1521_v32 }
 0xba3   :  { %v3426_v6 = vpop.eup %3425 }
 0xba4   :  { %v3428_v56 = vpop.eup %3427 }
 0xbf8   :  { %v1434_v14 = vpop.permute.xlu1 %1433 }
 0xbf9   :  { %v4055_v18 = vmul.f32 %v3426_v6, %v1434_v14 }
 0xbfb   :  { %2788 = vmatmul.mubr.msk.f32.vlgmr.msra.gmra.mrb[6].mxu1 %vm277_vm2, %v4055_v18 }
 0xbfc   :  { %3093 = vmatpush1.bf16.msra.mxu1 %v3823_v29  ;;  %1686 = vmatprep.mubr.f32.mxu1 %v3565_v1 }
 0xbfd   :  { %3095 = vmatprep.subr.bf16.mxu1 %v3826_v30 }
 0xc00   :  { %3097 = vmatpush1.bf16.msra.mxu1 %v3830_v36 }
 0xc01   :  { %3099 = vmatprep.subr.bf16.mxu1 %v3834_v39 }
 0xc04   :  { %3101 = vmatpush1.bf16.msra.mxu1 %v3837_v44 }
 0xc05   :  { %3103 = vmatprep.subr.bf16.mxu1 %v3842_v50 }
 0xc08   :  { %v1541_v7 = vpop.permute.xlu0 %1540  ;;  %3105 = vmatpush1.bf16.msra.mxu1 %v3844_v55 }
 0xc09   :  { %v1543_v11 = vmul.f32 %v3428_v56, %v1541_v7  ;;  %3123 = vmatprep.subr.bf16.mxu1 %v3797_v57 }
 0xc0b   :  { %v1544_v54 = vmax.f32 %v1543_v11, 0.0  ;;  %2792 = vmatmul.mubr.msk.f32.vlgmr.msra.gmra.mrb[10].mxu0 %vm277_vm2, %v1543_v11 }
 0xc0c   :  { %3157 = vmatpush1.bf16.msra.mxu0 %v3666_v10  ;;  %2081 = vmatprep.mubr.f32.mxu0 %v3565_v1 }
 0xc0d   :  { %2789 = vmatmul.mubr.msk.f32.vlgmr.msra.gmra.mrb[6].mxu1 %vm277_vm2, %v1544_v54  ;;  %3159 = vmatprep.subr.bf16.mxu0 %v3680_v15 }
 0xc0e   :  { %3125 = vmatpush1.bf16.msra.mxu1 %v3799_v61  ;;  %1900 = vmatprep.mubr.f32.mxu1 %v3565_v1 }
 0xc0f   :  { %3127 = vmatprep.subr.bf16.mxu1 %v3801_v62 }
 0xc10   :  { %3161 = vmatpush1.bf16.msra.mxu0 %v3695_v19 }
 0xc11   :  { %3163 = vmatprep.subr.bf16.mxu0 %v3698_v20 }
 0xc12   :  { %3129 = vmatpush1.bf16.msra.mxu1 %v3805_v4 }
 0xc13   :  { %3131 = vmatprep.subr.bf16.mxu1 %v3808_v5 }
 0xc14   :  { %3165 = vmatpush1.bf16.msra.mxu0 %v3718_v26 }
 0xc15   :  { %3167 = vmatprep.subr.bf16.mxu0 %v3721_v27 }
 0xc16   :  { %3133 = vmatpush1.bf16.msra.mxu1 %v3811_v12 }
 0xc17   :  { %3135 = vmatprep.subr.bf16.mxu1 %v3814_v13 }
 0xc18   :  { %3169 = vmatpush1.bf16.msra.mxu0 %v3735_v31 }
 0xc19   :  { %3203 = vmatprep.subr.bf16.mxu0 %v3664_v9 }
 0xc1a   :  { %3137 = vmatpush1.bf16.msra.mxu1 %v3817_v21 }
 0xc1b   :  { %3139 = vmatprep.subr.bf16.mxu1 %v3820_v22 }
 0xcde   :  { %v1795_v23 = vpop.f32.mrb[10].mxu0 }
 0xcdf   :  { %v1797_v24 = vpop.f32.mrb[11].mxu0  ;;  %v3276_v9 = vadd.f32 %v1795_v23, %v3790_v46 }
 0xce0   :  { %v3277_v25 = vadd.f32 %v1797_v24, %v3780_v40  ;;  %v1688_v33 = vpop.f32.mrb[6].mxu1 }
 0xce1   :  { %v1690_v59 = vpop.f32.mrb[7].mxu1  ;;  %v2793_v43 = vmul.f32 -1.442695, %v3276_v9  ;;  %v1693_v47 = vadd.f32 %v1688_v33, %v3888_v38 }
 0xce2   :  { %3429 = vtanh.f32 %v3277_v25  ;;  %v1694_v34 = vadd.f32 %v1690_v59, %v3879_v8  ;;  %v2794_v23 = vmul.f32 -1.442695, %v3277_v25 }
 0xce3   :  { %v2790_v48 = vmul.f32 -1.442695, %v1693_v47 }
 0xce4   :  { %3431 = vtanh.f32 %v1694_v34 }
 0xce5   :  { %3433 = vpow2.f32 %v2793_v43 }
 0xce6   :  { %3435 = vpow2.f32 %v2790_v48 }
 0xcec   :  { %v3430_v35 = vpop.eup %3429 }
 0xced   :  { %1817 = vrot.lane.b32.xlu0 %v3430_v35, %s3566_s14 }
 0xcee   :  { %v3432_v42 = vpop.eup %3431 }
 0xcef   :  { %1710 = vrot.lane.b32.xlu1 %v3432_v42, %s3566_s14  ;;  %v3434_v45 = vpop.eup %3433 }
 0xcf0   :  { %v1808_v49 = vadd.f32 1.0, %v3434_v45  ;;  %v3436_v58 = vpop.eup %3435 }
 0xcf1   :  { %v1701_v37 = vadd.f32 1.0, %v3436_v58 }
 0xcf2   :  { %3437 = vrcp.f32 %v1808_v49 }
 0xcf3   :  { %3439 = vrcp.f32 %v1701_v37 }
 0xcfc   :  { %v3438_v53 = vpop.eup %3437 }
 0xcfd   :  { %v3440_v28 = vpop.eup %3439  ;;  %v1815_v3 = vmul.f32 %v3438_v53, %v4051_v51  ;;  %v2791_v51 = vmul.f32 -1.442695, %v1694_v34 }
 0xcfe   :  { %v1708_v32 = vmul.f32 %v3440_v28, %v4046_v52 }
 0xd5f   :  { %v1818_v60 = vpop.permute.xlu0 %1817 }
 0xd60   :  { %v1820_v63 = vmul.f32 %v3438_v53, %v1818_v60 }
 0xd61   :  { %v1711_v0 = vpop.permute.xlu1 %1710 }
 0xd62   :  { %1822 = vrot.lane.b32.xlu0 %v1820_v63, %s3566_s14  ;;  %v1713_v2 = vmul.f32 %v3440_v28, %v1711_v0 }
 0xd64   :  { %1715 = vrot.lane.b32.xlu1 %v1713_v2, %s3566_s14 }
 0xdd4   :  { %v1823_v6 = vpop.permute.xlu0 %1822 }
 0xdd5   :  { %v4097_v14 = vadd.f32 %v1823_v6, %v1815_v3 }
 0xdd6   :  { %v1716_v56 = vpop.permute.xlu1 %1715 }
 0xdd7   :  { %3441 = vtanh.f32 %v4097_v14  ;;  %v4101_v7 = vadd.f32 %v1716_v56, %v1708_v32 }
 0xdd9   :  { %3443 = vtanh.f32 %v4101_v7 }
 0xdda   :  { %3445 = vpow2.f32 %v2794_v23 }
 0xddb   :  { %3447 = vpow2.f32 %v2791_v51 }
 0xde1   :  { %v3442_v11 = vpop.eup %3441 }
 0xde2   :  { %1828 = vrot.lane.b32.xlu0 %v3442_v11, %s3566_s14 }
 0xde3   :  { %v3444_v54 = vpop.eup %3443 }
 0xde4   :  { %1721 = vrot.lane.b32.xlu1 %v3444_v54, %s3566_s14  ;;  %v3446_v24 = vpop.eup %3445 }
 0xde5   :  { %v1809_v33 = vadd.f32 1.0, %v3446_v24  ;;  %v3448_v59 = vpop.eup %3447 }
 0xde6   :  { %v1702_v52 = vadd.f32 1.0, %v3448_v59 }
 0xde7   :  { %3449 = vrcp.f32 %v1809_v33 }
 0xde8   :  { %3451 = vrcp.f32 %v1702_v52 }
 0xdf1   :  { %v3450_v35 = vpop.eup %3449 }
 0xdf2   :  { %v3452_v43 = vpop.eup %3451 }
 0xe54   :  { %v1829_v42 = vpop.permute.xlu0 %1828 }
 0xe55   :  { %v1831_v9 = vmul.f32 %v3450_v35, %v1829_v42 }
 0xe56   :  { %v1722_v25 = vpop.permute.xlu1 %1721 }
 0xe57   :  { %2799 = vmatmul.mubr.msk.f32.vlgmr.msra.gmra.mrb[12].mxu0 %vm277_vm2, %v1831_v9  ;;  %v4110_v34 = vmul.f32 %v3452_v43, %v1722_v25 }
 0xe58   :  { %3205 = vmatpush1.bf16.msra.mxu0 %v3666_v10  ;;  %2369 = vmatprep.mubr.f32.mxu0 %v3565_v1  ;;  %v1832_v10 = vmax.f32 %v1831_v9, 0.0 }
 0xe59   :  { %3207 = vmatprep.subr.bf16.mxu0 %v3680_v15  ;;  %2795 = vmatmul.mubr.msk.f32.vlgmr.msra.gmra.mrb[8].mxu1 %vm277_vm2, %v4110_v34 }
 0xe5a   :  { %3141 = vmatpush1.bf16.msra.mxu1 %v3823_v29  ;;  %1974 = vmatprep.mubr.f32.mxu1 %v3565_v1 }
 0xe5b   :  { %3143 = vmatprep.subr.bf16.mxu1 %v3826_v30 }
 0xe5c   :  { %3209 = vmatpush1.bf16.msra.mxu0 %v3695_v19 }
 0xe5d   :  { %3211 = vmatprep.subr.bf16.mxu0 %v3698_v20 }
 0xe5e   :  { %3145 = vmatpush1.bf16.msra.mxu1 %v3830_v36 }
 0xe5f   :  { %3147 = vmatprep.subr.bf16.mxu1 %v3834_v39 }
 0xe60   :  { %3213 = vmatpush1.bf16.msra.mxu0 %v3718_v26 }
 0xe61   :  { %3215 = vmatprep.subr.bf16.mxu0 %v3721_v27 }
 0xe62   :  { %3149 = vmatpush1.bf16.msra.mxu1 %v3837_v44 }
 0xe63   :  { %3151 = vmatprep.subr.bf16.mxu1 %v3842_v50 }
 0xe64   :  { %3217 = vmatpush1.bf16.msra.mxu0 %v3735_v31 }
 0xe65   :  { %3219 = vmatprep.subr.bf16.mxu0 %v3797_v57 }
 0xe66   :  { %3153 = vmatpush1.bf16.msra.mxu1 %v3844_v55 }
 0xe67   :  { %3171 = vmatprep.subr.bf16.mxu1 %v3797_v57 }
 0xe69   :  { %2796 = vmatmul.mubr.msk.f32.vlgmr.msra.gmra.mrb[8].mxu1 %vm277_vm2, %v1832_v10 }
 0xe6a   :  { %3173 = vmatpush1.bf16.msra.mxu1 %v3799_v61  ;;  %2188 = vmatprep.mubr.f32.mxu1 %v3565_v1 }
 0xe6b   :  { %3175 = vmatprep.subr.bf16.mxu1 %v3801_v62 }
 0xe6e   :  { %3177 = vmatpush1.bf16.msra.mxu1 %v3805_v4 }
 0xe6f   :  { %3179 = vmatprep.subr.bf16.mxu1 %v3808_v5 }
 0xe72   :  { %3181 = vmatpush1.bf16.msra.mxu1 %v3811_v12 }
 0xe73   :  { %3183 = vmatprep.subr.bf16.mxu1 %v3814_v13 }
 0xe76   :  { %3185 = vmatpush1.bf16.msra.mxu1 %v3817_v21 }
 0xe77   :  { %3187 = vmatprep.subr.bf16.mxu1 %v3820_v22 }
 0xf2a   :  { %v2083_v15 = vpop.f32.mrb[12].mxu0 }
 0xf2b   :  { %v2085_v19 = vpop.f32.mrb[13].mxu0  ;;  %v3278_v48 = vadd.f32 %v2083_v15, %v3790_v46 }
 0xf2c   :  { %v3279_v20 = vadd.f32 %v2085_v19, %v3780_v40 }
 0xf2d   :  { %v2800_v45 = vmul.f32 -1.442695, %v3278_v48  ;;  %v861_v48 = vmax.f32 %v3963_v41, 0.0 }
 0xf2e   :  { %3453 = vtanh.f32 %v3279_v20  ;;  %v2801_v52 = vmul.f32 -1.442695, %v3279_v20  ;;  %v573_v20 = vmax.f32 %v3906_v17, 0.0  ;;  %v2597_v17 = vld [vmem:[%s4294_s7 + $0x38] sm:$0xff] }
 0xf38   :  { %v3454_v26 = vpop.eup %3453 }
 0xf39   :  { %2105 = vrot.lane.b32.xlu0 %v3454_v26, %s3566_s14  ;;  %v2594_v26 = vld [vmem:[%s4294_s7 + $0x20] sm:$0xff] }
 0xf3c   :  { %v1976_v27 = vpop.f32.mrb[8].mxu1 }
 0xf3d   :  { %v1978_v31 = vpop.f32.mrb[9].mxu1  ;;  %v1981_v37 = vadd.f32 %v1976_v27, %v3888_v38  ;;  %v2595_v27 = vld [vmem:[%s4294_s7 + $0x28] sm:$0xff] }
 0xf3e   :  { %v1982_v57 = vadd.f32 %v1978_v31, %v3879_v8  ;;  %v3258_v31 = vpack.c.bf16 %v2595_v27, %v2594_v26 }
 0xf3f   :  { %v2797_v53 = vmul.f32 -1.442695, %v1981_v37 }
 0xf40   :  { %3455 = vtanh.f32 %v1982_v57  ;;  %v2798_v42 = vmul.f32 -1.442695, %v1982_v57  ;;  %v2596_v57 = vld [vmem:[%s4294_s7 + $0x30] sm:$0xff] }
 0xf41   :  { %3457 = vpow2.f32 %v2800_v45  ;;  %v1149_v45 = vmax.f32 %v4004_v16, 0.0 }
 0xf4a   :  { %v3456_v47 = vpop.eup %3455 }
 0xf4b   :  { %1998 = vrot.lane.b32.xlu1 %v3456_v47, %s3566_s14  ;;  %v3458_v49 = vpop.eup %3457  ;;  %v3262_v47 = vpack.c.bf16 %v2597_v17, %v2596_v57 }
 0xf4c   :  { %v2096_v58 = vadd.f32 1.0, %v3458_v49  ;;  %v1437_v49 = vmax.f32 %v4055_v18, 0.0 }
 0xf4e   :  { %3459 = vrcp.f32 %v2096_v58  ;;  %v1725_v58 = vmax.f32 %v4110_v34, 0.0 }
 0xf4f   :  { %3461 = vpow2.f32 %v2797_v53 }
 0xf58   :  { %v3460_v60 = vpop.eup %3459 }
 0xf59   :  { %v3462_v0 = vpop.eup %3461  ;;  %v2103_v56 = vmul.f32 %v3460_v60, %v4097_v14 }
 0xf5a   :  { %v1989_v2 = vadd.f32 1.0, %v3462_v0  ;;  %v4218_v0 = vld [vmem:[#allocation2] ss:$0 sm:$0xff] }
 0xf5c   :  { %3463 = vrcp.f32 %v1989_v2 }
 0xf66   :  { %v3464_v3 = vpop.eup %3463 }
 0xf67   :  { %v1996_v51 = vmul.f32 %v3464_v3, %v4101_v7 }
 0xfab   :  { %v2106_v63 = vpop.permute.xlu0 %2105 }
 0xfac   :  { %v2108_v28 = vmul.f32 %v3460_v60, %v2106_v63 }
 0xfae   :  { %2110 = vrot.lane.b32.xlu0 %v2108_v28, %s3566_s14 }
 0xfbd   :  { %v1999_v6 = vpop.permute.xlu1 %1998 }
 0xfbe   :  { %v2001_v32 = vmul.f32 %v3464_v3, %v1999_v6 }
 0xfc0   :  { %2003 = vrot.lane.b32.xlu1 %v2001_v32, %s3566_s14 }
0x1020   :  { %v2111_v11 = vpop.permute.xlu0 %2110 }
0x1021   :  { %v4148_v54 = vadd.f32 %v2111_v11, %v2103_v56 }
0x1023   :  { %3465 = vtanh.f32 %v4148_v54 }
0x102d   :  { %v3466_v23 = vpop.eup %3465 }
0x102e   :  { %2116 = vrot.lane.b32.xlu0 %v3466_v23, %s3566_s14 }
0x1032   :  { %v2004_v24 = vpop.permute.xlu1 %2003 }
0x1033   :  { %v4153_v33 = vadd.f32 %v2004_v24, %v1996_v51 }
0x1035   :  { %3467 = vtanh.f32 %v4153_v33 }
0x1036   :  { %3469 = vpow2.f32 %v2801_v52 }
0x103f   :  { %v3468_v59 = vpop.eup %3467 }
0x1040   :  { %2009 = vrot.lane.b32.xlu1 %v3468_v59, %s3566_s14  ;;  %v3470_v14 = vpop.eup %3469 }
0x1041   :  { %v2097_v35 = vadd.f32 1.0, %v3470_v14 }
0x1043   :  { %3471 = vrcp.f32 %v2097_v35 }
0x1044   :  { %3473 = vpow2.f32 %v2798_v42 }
0x104d   :  { %v3472_v9 = vpop.eup %3471 }
0x104e   :  { %v3474_v7 = vpop.eup %3473 }
0x104f   :  { %v1990_v10 = vadd.f32 1.0, %v3474_v7 }
0x1051   :  { %3475 = vrcp.f32 %v1990_v10 }
0x105b   :  { %v3476_v15 = vpop.eup %3475 }
0x10a0   :  { %v2117_v43 = vpop.permute.xlu0 %2116 }
0x10a1   :  { %v2119_v25 = vmul.f32 %v3472_v9, %v2117_v43 }
0x10a3   :  { %2806 = vmatmul.mubr.msk.f32.vlgmr.msra.gmra.mrb[14].mxu0 %vm277_vm2, %v2119_v25 }
0x10a4   :  { %3221 = vmatpush1.bf16.msra.mxu0 %v3799_v61  ;;  %2476 = vmatprep.mubr.f32.mxu0 %v3565_v1 }
0x10a5   :  { %3223 = vmatprep.subr.bf16.mxu0 %v3801_v62  ;;  %v2590_v62 = vld [vmem:[%s4294_s7] sm:$0xff] }
0x10a8   :  { %3225 = vmatpush1.bf16.msra.mxu0 %v3805_v4  ;;  %v2591_v4 = vld [vmem:[%s4294_s7 + $0x8] sm:$0xff] }
0x10a9   :  { %3227 = vmatprep.subr.bf16.mxu0 %v3808_v5  ;;  %v3250_v5 = vpack.c.bf16 %v2591_v4, %v2590_v62 }
0x10ac   :  { %3229 = vmatpush1.bf16.msra.mxu0 %v3811_v12  ;;  %v2592_v12 = vld [vmem:[%s4294_s7 + $0x10] sm:$0xff] }
0x10ad   :  { %3231 = vmatprep.subr.bf16.mxu0 %v3814_v13  ;;  %v2593_v13 = vld [vmem:[%s4294_s7 + $0x18] sm:$0xff] }
0x10b0   :  { %3233 = vmatpush1.bf16.msra.mxu0 %v3817_v21  ;;  %v2120_v21 = vmax.f32 %v2119_v25, 0.0 }
0x10b1   :  { %3235 = vmatprep.subr.bf16.mxu0 %v3820_v22  ;;  %v3254_v22 = vpack.c.bf16 %v2593_v13, %v2592_v12 }
0x10b2   :  { %v2010_v61 = vpop.permute.xlu1 %2009 }
0x10b3   :  { %v2012_v19 = vmul.f32 %v3476_v15, %v2010_v61 }
0x10b5   :  { %2802 = vmatmul.mubr.msk.f32.vlgmr.msra.gmra.mrb[10].mxu1 %vm277_vm2, %v2012_v19  ;;  %v2013_v37 = vmax.f32 %v2012_v19, 0.0 }
0x10b6   :  { %3189 = vmatpush1.bf16.msra.mxu1 %v3823_v29  ;;  %2262 = vmatprep.mubr.f32.mxu1 %v3565_v1 }
0x10b7   :  { %3191 = vmatprep.subr.bf16.mxu1 %v3826_v30 }
0x10ba   :  { %3193 = vmatpush1.bf16.msra.mxu1 %v3830_v36 }
0x10bb   :  { %3195 = vmatprep.subr.bf16.mxu1 %v3834_v39 }
0x10be   :  { %3197 = vmatpush1.bf16.msra.mxu1 %v3837_v44 }
0x10bf   :  { %3199 = vmatprep.subr.bf16.mxu1 %v3842_v50 }
0x10c2   :  { %3201 = vmatpush1.bf16.msra.mxu1 %v3844_v55 }
0x10c3   :  { %3251 = vmatprep.subr.bf16.mxu1 %v3250_v5 }
0x10c5   :  { %2803 = vmatmul.mubr.msk.f32.vlgmr.msra.gmra.mrb[10].mxu1 %vm277_vm2, %v2120_v21 }
0x10c6   :  { %3253 = vmatpush3.bf16.msra.mxu1 %v3250_v5  ;;  %2854 = vmatprep.mubr.msk.f32.mxu1 %vm277_vm2, %v573_v20 }
0x10c7   :  { %3255 = vmatprep.subr.bf16.mxu1 %v3254_v22 }
0x10ca   :  { %3257 = vmatpush3.bf16.msra.mxu1 %v3254_v22 }
0x10cb   :  { %3259 = vmatprep.subr.bf16.mxu1 %v3258_v31 }
0x10ce   :  { %3261 = vmatpush3.bf16.msra.mxu1 %v3258_v31 }
0x10cf   :  { %3263 = vmatprep.subr.bf16.mxu1 %v3262_v47 }
0x10d2   :  { %3265 = vmatpush3.bf16.msra.mxu1 %v3262_v47 }
0x10d5   :  { %2855 = vmatmul.mubr.msk.f32.vlgmr.msra.gmra.mrb[12].mxu1 %vm277_vm2, %v861_v48 }
0x10d6   :  { %2857 = vmatprep.mubr.msk.f32.mxu1 %vm277_vm2, %v1149_v45 }
0x10d9   :  { %2858 = vmatmul.mubr.msk.f32.gmra.mrb[14].mxu1 %vm277_vm2, %v1437_v49 }
0x10da   :  { %2860 = vmatprep.mubr.msk.f32.mxu1 %vm277_vm2, %v1725_v58 }
0x10dd   :  { %2861 = vmatmul.mubr.msk.f32.gmra.mrb[16].mxu1 %vm277_vm2, %v2013_v37 }
0x1176   :  { %v2371_v53 = vpop.f32.mrb[14].mxu0 }
0x1177   :  { %v2373_v60 = vpop.f32.mrb[15].mxu0  ;;  %v3280_v14 = vadd.f32 %v2371_v53, %v3790_v46 }
0x1178   :  { %v4213_v41 = vadd.f32 %v2373_v60, %v3780_v40 }
0x1179   :  { %v2807_v35 = vmul.f32 -1.442695, %v3280_v14 }
0x117a   :  { %3477 = vtanh.f32 %v4213_v41  ;;  %v2808_v57 = vmul.f32 -1.442695, %v4213_v41 }
0x1184   :  { %v3478_v16 = vpop.eup %3477 }
0x1185   :  { %2393 = vrot.lane.b32.xlu0 %v3478_v16, %s3566_s14 }
0x1198   :  { %v2264_v18 = vpop.f32.mrb[10].mxu1 }
0x1199   :  { %v2266_v63 = vpop.f32.mrb[11].mxu1  ;;  %v2269_v10 = vadd.f32 %v2264_v18, %v3888_v38 }
0x119a   :  { %v2270_v34 = vadd.f32 %v2266_v63, %v3879_v8 }
0x119b   :  { %v2804_v15 = vmul.f32 -1.442695, %v2269_v10 }
0x119c   :  { %3479 = vtanh.f32 %v2270_v34  ;;  %v2805_v31 = vmul.f32 -1.442695, %v2270_v34 }
0x119d   :  { %3481 = vpow2.f32 %v2807_v35 }
0x11a6   :  { %v3480_v28 = vpop.eup %3479 }
0x11a7   :  { %2286 = vrot.lane.b32.xlu1 %v3480_v28, %s3566_s14  ;;  %v3482_v42 = vpop.eup %3481 }
0x11a8   :  { %v2856_v2 = vpop.f32.mrb[12].mxu1  ;;  %v2384_v9 = vadd.f32 1.0, %v3482_v42 }
0x11a9   :  { %v2701_v40 = vadd.f32 %v2856_v2, %v4218_v0  ;;  %v2695_v3 = vpop.f32.mrb[13].mxu1 }
0x11aa   :  { %v2696_v6 = vadd.f32 %v4218_v0, %v2695_v3  ;;  %3483 = vrcp.f32 %v2384_v9 }
0x11ab   :  { %2736 = vst.msk [vmem:[%s4296_s9 + $0x8] sm:$0xff] %vm2734_vm3, %v2701_v40  ;;  %3485 = vpow2.f32 %v2804_v15 }
0x11ac   :  { %2735 = vst.msk [vmem:[%s4296_s9] sm:$0xff] %vm2734_vm3, %v2696_v6  ;;  %v2859_v32 = vpop.f32.mrb[14].mxu1 }
0x11ad   :  { %v2711_v56 = vadd.f32 %v2859_v32, %v4218_v0  ;;  %v2705_v11 = vpop.f32.mrb[15].mxu1 }
0x11ae   :  { %v2706_v23 = vadd.f32 %v4218_v0, %v2705_v11 }
0x11af   :  { %2738 = vst.msk [vmem:[%s4296_s9 + $0x18] sm:$0xff] %vm2734_vm3, %v2711_v56 }
0x11b0   :  { %2737 = vst.msk [vmem:[%s4296_s9 + $0x10] sm:$0xff] %vm2734_vm3, %v2706_v23  ;;  %v2862_v51 = vpop.f32.mrb[16].mxu1 }
0x11b1   :  { %v2721_v24 = vadd.f32 %v2862_v51, %v4218_v0  ;;  %v2715_v59 = vpop.f32.mrb[17].mxu1 }
0x11b2   :  { %v2716_v52 = vadd.f32 %v4218_v0, %v2715_v59 }
0x11b3   :  { %2740 = vst.msk [vmem:[%s4296_s9 + $0x28] sm:$0xff] %vm2734_vm3, %v2721_v24 }
0x11b4   :  { %2739 = vst.msk [vmem:[%s4296_s9 + $0x20] sm:$0xff] %vm2734_vm3, %v2716_v52  ;;  %v3484_v43 = vpop.eup %3483 }
0x11b5   :  { %v3486_v61 = vpop.eup %3485  ;;  %v2391_v5 = vmul.f32 %v3484_v43, %v4148_v54 }
0x11b6   :  { %v2277_v19 = vadd.f32 1.0, %v3486_v61 }
0x11b8   :  { %3487 = vrcp.f32 %v2277_v19 }
0x11c2   :  { %v3488_v62 = vpop.eup %3487 }
0x11c3   :  { %v2284_v22 = vmul.f32 %v3488_v62, %v4153_v33 }
0x11f7   :  { %v2394_v25 = vpop.permute.xlu0 %2393 }
0x11f8   :  { %v2396_v7 = vmul.f32 %v3484_v43, %v2394_v25 }
0x11fa   :  { %2398 = vrot.lane.b32.xlu0 %v2396_v7, %s3566_s14 }
0x1219   :  { %v2287_v4 = vpop.permute.xlu1 %2286 }
0x121a   :  { %v2289_v46 = vmul.f32 %v3488_v62, %v2287_v4 }
0x121c   :  { %2291 = vrot.lane.b32.xlu1 %v2289_v46, %s3566_s14 }
0x126c   :  { %v2399_v12 = vpop.permute.xlu0 %2398 }
0x126d   :  { %v2401_v13 = vadd.f32 %v2399_v12, %v2391_v5 }
0x126f   :  { %3489 = vtanh.f32 %v2401_v13 }
0x1279   :  { %v3490_v21 = vpop.eup %3489 }
0x127a   :  { %2404 = vrot.lane.b32.xlu0 %v3490_v21, %s3566_s14 }
0x128e   :  { %v2292_v20 = vpop.permute.xlu1 %2291 }
0x128f   :  { %v2294_v26 = vadd.f32 %v2292_v20, %v2284_v22 }
0x1291   :  { %3491 = vtanh.f32 %v2294_v26 }
0x1292   :  { %3493 = vpow2.f32 %v2805_v31 }
0x1293   :  { %3495 = vpow2.f32 %v2808_v57 }
0x129b   :  { %v3492_v27 = vpop.eup %3491 }
0x129c   :  { %2297 = vrot.lane.b32.xlu1 %v3492_v27, %s3566_s14  ;;  %v3494_v17 = vpop.eup %3493 }
0x129d   :  { %v2278_v54 = vadd.f32 1.0, %v3494_v17  ;;  %v3496_v47 = vpop.eup %3495 }
0x129e   :  { %v2385_v48 = vadd.f32 1.0, %v3496_v47 }
0x129f   :  { %3497 = vrcp.f32 %v2278_v54 }
0x12a0   :  { %3499 = vrcp.f32 %v2385_v48 }
0x12a9   :  { %v3498_v45 = vpop.eup %3497 }
0x12aa   :  { %v3500_v53 = vpop.eup %3499 }
0x12ec   :  { %v2405_v37 = vpop.permute.xlu0 %2404 }
0x12ed   :  { %v2407_v60 = vmul.f32 %v3500_v53, %v2405_v37 }
0x130e   :  { %v2298_v49 = vpop.permute.xlu1 %2297 }
0x130f   :  { %v2300_v58 = vmul.f32 %v3498_v45, %v2298_v49 }
0x1311   :  { %v2301_v33 = vmax.f32 %v2300_v58, 0.0  ;;  %2809 = vmatmul.mubr.msk.f32.vlgmr.msra.gmra.mrb[18].mxu0 %vm277_vm2, %v2300_v58 }
0x1312   :  { %3237 = vmatpush1.bf16.msra.mxu0 %v3823_v29  ;;  %2550 = vmatprep.mubr.f32.mxu0 %v3565_v1  ;;  %v2408_v29 = vmax.f32 %v2407_v60, 0.0 }
0x1313   :  { %2863 = vmatprep.mubr.msk.f32.mxu1 %vm277_vm2, %v2301_v33  ;;  %3239 = vmatprep.subr.bf16.mxu0 %v3826_v30 }
0x1316   :  { %3241 = vmatpush1.bf16.msra.mxu0 %v3830_v36 }
0x1317   :  { %3243 = vmatprep.subr.bf16.mxu0 %v3834_v39 }
0x131a   :  { %3245 = vmatpush1.bf16.msra.mxu0 %v3837_v44 }
0x131b   :  { %3247 = vmatprep.subr.bf16.mxu0 %v3842_v50 }
0x131e   :  { %3249 = vmatpush1.bf16.msra.mxu0 %v3844_v55 }
0x1321   :  { %2810 = vmatmul.mubr.msk.f32.vlgmr.msra.gmra.mrb[18].mxu0 %vm277_vm2, %v2408_v29 }
0x13f4   :  { %v2552_v1 = vpop.f32.mrb[18].mxu0 }
0x13f5   :  { %v2554_v41 = vpop.f32.mrb[19].mxu0  ;;  %v2557_v39 = vadd.f32 %v2552_v1, %v3888_v38 }
0x13f6   :  { %v2558_v30 = vadd.f32 %v2554_v41, %v3879_v8 }
0x13f7   :  { %v2811_v16 = vmul.f32 -1.442695, %v2557_v39 }
0x13f8   :  { %3501 = vtanh.f32 %v2558_v30  ;;  %v2812_v40 = vmul.f32 -1.442695, %v2558_v30 }
0x13f9   :  { %3503 = vpow2.f32 %v2811_v16 }
0x1402   :  { %v3502_v36 = vpop.eup %3501 }
0x1403   :  { %2574 = vrot.lane.b32.xlu1 %v3502_v36, %s3566_s14  ;;  %v3504_v44 = vpop.eup %3503 }
0x1404   :  { %v2565_v18 = vadd.f32 1.0, %v3504_v44 }
0x1406   :  { %3505 = vrcp.f32 %v2565_v18 }
0x1410   :  { %v3506_v50 = vpop.eup %3505 }
0x1411   :  { %v2572_v34 = vmul.f32 %v3506_v50, %v2294_v26 }
0x1475   :  { %v2575_v55 = vpop.permute.xlu1 %2574 }
0x1476   :  { %v2577_v63 = vmul.f32 %v3506_v50, %v2575_v55 }
0x1478   :  { %2579 = vrot.lane.b32.xlu0 %v2577_v63, %s3566_s14 }
0x14ea   :  { %v2580_v28 = vpop.permute.xlu0 %2579 }
0x14eb   :  { %v2582_v2 = vadd.f32 %v2580_v28, %v2572_v34 }
0x14ed   :  { %3507 = vtanh.f32 %v2582_v2 }
0x14ee   :  { %3509 = vpow2.f32 %v2812_v40 }
0x14f7   :  { %v3508_v8 = vpop.eup %3507 }
0x14f8   :  { %2585 = vrot.lane.b32.xlu1 %v3508_v8, %s3566_s14  ;;  %v3510_v38 = vpop.eup %3509 }
0x14f9   :  { %v2566_v3 = vadd.f32 1.0, %v3510_v38 }
0x14fb   :  { %3511 = vrcp.f32 %v2566_v3 }
0x1505   :  { %v3512_v6 = vpop.eup %3511 }
0x156a   :  { %v2586_v32 = vpop.permute.xlu1 %2585 }
0x156b   :  { %v2588_v56 = vmul.f32 %v3512_v6, %v2586_v32 }
0x156d   :  { %v2589_v11 = vmax.f32 %v2588_v56, 0.0 }
0x156f   :  { %2864 = vmatmul.mubr.msk.f32.gmra.mrb[18].mxu1 %vm277_vm2, %v2589_v11 }
0x1642   :  { %v2865_v23 = vpop.f32.mrb[18].mxu1 }
0x1643   :  { %v2731_v51 = vadd.f32 %v2865_v23, %v4218_v0  ;;  %v2725_v24 = vpop.f32.mrb[19].mxu1 }
0x1644   :  { %v2726_v59 = vadd.f32 %v4218_v0, %v2725_v24 }
0x1645   :  { %2742 = vst.msk [vmem:[%s4296_s9 + $0x38] sm:$0xff] %vm2734_vm3, %v2731_v51 }
0x1646   :  { %2741 = vst.msk [vmem:[%s4296_s9 + $0x30] sm:$0xff] %vm2734_vm3, %v2726_v59 }
0x1647   :  { %2747 = vsyncpa [#allocation4], 1 }
0x1648   :  { %2748 = vsyncpa [#allocation6], 1 }

</bundles_post_ra>
